<compile_context>
chip_gen: v7x
topology: tpu7x:2x2x1
jax: 0.10.0
libtpu: 0.0.40
codegen_flags: <defaults>
</compile_context>

<pallas_src>
import numpy as np

import jax
import jax.numpy as jnp
from jax.experimental import pallas as pl
from jax.experimental.pallas import tpu as pltpu

MAX_BATCH_TILE = 512  # rows per grid step (multiple of 8; ~8 MB VMEM at this size)


def _round_up(v, m):
    return ((v + m - 1) // m) * m


# ---------------------------------------------------------------------------
# Fused Pallas kernel: 6 matmuls (+bias/ReLU) and one 2x2 maxpool, all in VMEM.
# ---------------------------------------------------------------------------
def _fused_kernel(x_ref,
                  w1, b1, w2, b2, w3, b3, w4, b4, w5, b5, w6, b6,
                  o_ref):
    def mm(a, w_ref, b_ref, relu):
        # bf16 operands on the MXU, f32 accumulate, f32 epilogue (bias + ReLU on the VPU).
        y = jnp.dot(a.astype(w_ref.dtype), w_ref[...],
                    preferred_element_type=jnp.float32)
        y = y + b_ref[...]
        return jnp.maximum(y, 0.0) if relu else y

    x = x_ref[...]                                   # (NB, 192)  CHW-flat input, bf16

    # Encoder
    y1 = mm(x, w1, b1, True)                         # Conv(3->8,k3,p1)+ReLU -> (NB, 512)
    # MaxPool2d(2,2): columns of y1 are grouped by pooling tap, so the pool is a max over
    # four lane-aligned 128-wide slices (pure VPU filler, no layout ops).
    p = jnp.maximum(jnp.maximum(y1[:, 0:128], y1[:, 128:256]),
                    jnp.maximum(y1[:, 256:384], y1[:, 384:512]))      # (NB, 128)
    y2 = mm(p,  w2, b2, True)                        # Conv(8->8,k3,p1)+ReLU      (NB, 128)
    y3 = mm(y2, w3, b3, True)                        # Conv(8->8,k1)+ReLU         (NB, 128)

    # Decoder (L4/L5/L6 = Linear(128,64) -> Linear(64,128) -> ConvT(8,8,k1) fused into one
    # matrix at pack time; ReLU applied after, matching the original module).
    d1 = mm(y3, w4, b4, True)                        # fused FC+FC+ConvT1x1+ReLU  (NB, 128)
    d2 = mm(d1, w5, b5, True)                        # ConvT(8->16,k3,s2,p1,op1)+ReLU (NB,1024)
    # Final ConvT(16->3,k3,p1): output padded to 256 lanes (cols 192..255 are zero).
    o_ref[...] = mm(d2, w6, b6, False).astype(o_ref.dtype)            # (NB, 256)


# ---------------------------------------------------------------------------
# One-time host-side parameter packing (all layout plumbing lives here).
# ---------------------------------------------------------------------------
def pack_params(params):
    """Pack PyTorch-layout parameters into dense matmul operands.

    Every layer becomes a (Din, Dout) matrix + (1, Dout) bias row.  Spatial index maps
    (padding, stride-2 transposed-conv scatter, kernel taps), the 2x2 maxpool tap grouping,
    and the NCHW<->HWC / view() permutations around the FC layers are folded into the
    row/column orderings.  L4/L5/L6 are composed into one matrix (f64 host math, single
    bf16 cast).  The last matrix is zero-padded to 256 output columns so the kernel's
    store path is lane-dense.  Weights are bf16 (MXU operands), biases f32."""
    g = lambda n: np.asarray(params[n], dtype=np.float32)

    wc1, bc1 = g("enc_c1_w"), g("enc_c1_b")      # (8,3,3,3), (8,)
    wc2, bc2 = g("enc_c2_w"), g("enc_c2_b")      # (8,8,3,3), (8,)
    wc3, bc3 = g("enc_c3_w"), g("enc_c3_b")      # (8,8,1,1), (8,)
    wfe, bfe = g("enc_fc_w"), g("enc_fc_b")      # (64,128), (64,)
    wfd, bfd = g("dec_fc_w"), g("dec_fc_b")      # (128,64), (128,)
    wt1, bt1 = g("dec_t1_w"), g("dec_t1_b")      # (8,8,1,1), (8,)
    wt2, bt2 = g("dec_t2_w"), g("dec_t2_b")      # (8,16,3,3), (16,)
    wt3, bt3 = g("dec_t3_w"), g("dec_t3_b")      # (16,3,3,3), (3,)

    # --- L1: Conv2d(3,8,k3,p1) on 8x8.  Rows: input CHW-flat (c*64+h*8+w).
    # Columns grouped by pooling tap: col = tap*128 + (oh2*4+ow2)*8 + co with
    # (oh,ow) = (2*oh2+dh, 2*ow2+dw), tap = 2*dh+dw  -> maxpool = max of 4 column slices.
    W1 = np.zeros((192, 512), np.float32)
    B1 = np.zeros((512,), np.float32)
    for oh in range(8):
        for ow in range(8):
            tap = (oh % 2) * 2 + (ow % 2)
            col0 = tap * 128 + ((oh // 2) * 4 + (ow // 2)) * 8
            B1[col0:col0 + 8] = bc1
            for kh in range(3):
                ih = oh + kh - 1
                if not 0 <= ih < 8:
                    continue
                for kw in range(3):
                    iw = ow + kw - 1
                    if not 0 <= iw < 8:
                        continue
                    for ci in range(3):
                        W1[ci * 64 + ih * 8 + iw, col0:col0 + 8] = wc1[:, ci, kh, kw]

    # --- L2: Conv2d(8,8,k3,p1) on 4x4.  HWC-flat (h*4+w)*8+c on both sides.
    W2 = np.zeros((128, 128), np.float32)
    B2 = np.zeros((128,), np.float32)
    for oh in range(4):
        for ow in range(4):
            col0 = (oh * 4 + ow) * 8
            B2[col0:col0 + 8] = bc2
            for kh in range(3):
                ih = oh + kh - 1
                if not 0 <= ih < 4:
                    continue
                for kw in range(3):
                    iw = ow + kw - 1
                    if not 0 <= iw < 4:
                        continue
                    row0 = (ih * 4 + iw) * 8
                    W2[row0:row0 + 8, col0:col0 + 8] = wc2[:, :, kh, kw].T  # [ci, co]

    # --- L3: Conv2d(8,8,k1): block-diagonal over the 16 pixels.
    W3 = np.zeros((128, 128), np.float32)
    B3 = np.tile(bc3, 16)
    for p_ in range(16):
        W3[p_ * 8:p_ * 8 + 8, p_ * 8:p_ * 8 + 8] = wc3[:, :, 0, 0].T        # [ci, co]

    # --- L4: encoder Linear(128,64); fold PyTorch's NCHW view() flattening (c,h,w)
    #         into the row ordering (rows are HWC-flat).
    W4 = np.zeros((128, 64), np.float32)
    for h in range(4):
        for w in range(4):
            for c in range(8):
                W4[(h * 4 + w) * 8 + c, :] = wfe[:, c * 16 + h * 4 + w]
    B4 = bfe

    # --- L5: decoder Linear(64,128); fold view(8,4,4) (CHW) -> HWC column ordering.
    W5 = np.zeros((64, 128), np.float32)
    B5 = np.zeros((128,), np.float32)
    for h in range(4):
        for w in range(4):
            for c in range(8):
                W5[:, (h * 4 + w) * 8 + c] = wfd[c * 16 + h * 4 + w, :]
                B5[(h * 4 + w) * 8 + c] = bfd[c * 16 + h * 4 + w]

    # --- L6: ConvTranspose2d(8,8,k1,s1): block-diagonal over the 16 pixels.
    W6 = np.zeros((128, 128), np.float32)
    B6 = np.tile(bt1, 16)
    for p_ in range(16):
        W6[p_ * 8:p_ * 8 + 8, p_ * 8:p_ * 8 + 8] = wt1[:, :, 0, 0]          # [ci, co]

    # --- L7: ConvTranspose2d(8,16,k3,s2,p1,op1): 4x4x8 HWC -> 8x8x16 HWC.
    # out[oh,ow,co] += in[ih,iw,ci] * w[ci,co,kh,kw]  whenever oh=2*ih-1+kh, ow=2*iw-1+kw.
    W7 = np.zeros((128, 1024), np.float32)
    B7 = np.tile(bt2, 64)
    for ih in range(4):
        for iw in range(4):
            row0 = (ih * 4 + iw) * 8
            for kh in range(3):
                oh = 2 * ih - 1 + kh
                if not 0 <= oh < 8:
                    continue
                for kw in range(3):
                    ow = 2 * iw - 1 + kw
                    if not 0 <= ow < 8:
                        continue
                    col0 = (oh * 8 + ow) * 16
                    W7[row0:row0 + 8, col0:col0 + 16] = wt2[:, :, kh, kw]   # [ci, co]

    # --- L8: ConvTranspose2d(16,3,k3,s1,p1): 8x8x16 HWC -> CHW-flat output (matches the
    #         final NCHW tensor directly, so no output transpose is needed).
    W8 = np.zeros((1024, 192), np.float32)
    B8 = np.zeros((192,), np.float32)
    for c_out in range(3):
        B8[c_out * 64:c_out * 64 + 64] = bt3[c_out]
    for ih in range(8):
        for iw in range(8):
            row0 = (ih * 8 + iw) * 16
            for kh in range(3):
                oh = ih - 1 + kh
                if not 0 <= oh < 8:
                    continue
                for kw in range(3):
                    ow = iw - 1 + kw
                    if not 0 <= ow < 8:
                        continue
                    for c_out in range(3):
                        W8[row0:row0 + 16, c_out * 64 + oh * 8 + ow] = wt3[:, c_out, kh, kw]

    # --- Fuse L4 (FC 128->64), L5 (FC 64->128), L6 (ConvT 1x1): no nonlinearity between
    #     them, so compose in f64 on the host and cast to bf16 ONCE.
    W4d, W5d, W6d = W4.astype(np.float64), W5.astype(np.float64), W6.astype(np.float64)
    W456 = (W4d @ W5d @ W6d).astype(np.float32)
    B456 = ((B4.astype(np.float64) @ W5d + B5.astype(np.float64)) @ W6d
            + B6.astype(np.float64)).astype(np.float32)

    # --- Lane-dense output: pad 192 -> 256 columns with zeros (sliced off in the wrapper).
    W8p = np.zeros((1024, 256), np.float32)
    W8p[:, :192] = W8
    B8p = np.zeros((256,), np.float32)
    B8p[:192] = B8

    mats = [(W1, B1), (W2, B2), (W3, B3), (W456, B456), (W7, B7), (W8p, B8p)]
    packed = {}
    for i, (W, B) in enumerate(mats, start=1):
        packed[f"W{i}"] = jnp.asarray(W, dtype=jnp.bfloat16)   # MXU operands in bf16
        packed[f"B{i}"] = jnp.asarray(B.reshape(1, -1), dtype=jnp.float32)
    return packed


# ---------------------------------------------------------------------------
# Forward pass: exactly one pallas_call (grid over the batch only).
# ---------------------------------------------------------------------------
def delay_autoencoder_forward(packed, x_nchw):
    N = x_nchw.shape[0]
    # CHW-flat rows; ship as bf16 (first matmul consumes bf16) -> half the input DMA.
    x_flat = x_nchw.reshape(N, 192).astype(jnp.bfloat16)

    # Batch tile: multiple of 8, at most MAX_BATCH_TILE, and no larger than ceil(N/2)
    # rounded up, so moderate batches still yield >= 2 grid steps (v7x: both TensorCores
    # get work via dimension_semantics=("parallel",)).
    nb = min(MAX_BATCH_TILE, _round_up(max(-(-N // 2), 1), 8))
    grid = -(-N // nb)
    n_pad = grid * nb
    if n_pad != N:
        x_flat = jnp.pad(x_flat, ((0, n_pad - N), (0, 0)))

    wb_args, wb_specs = [], []
    for i in range(1, 7):
        w, b = packed[f"W{i}"], packed[f"B{i}"]
        wb_args += [w, b]
        wb_specs += [pl.BlockSpec(w.shape, lambda i: (0, 0)),   # weights: fetched once,
                     pl.BlockSpec(b.shape, lambda i: (0, 0))]   # VMEM-resident across steps

    out = pl.pallas_call(
        _fused_kernel,
        out_shape=jax.ShapeDtypeStruct((n_pad, 256), jnp.float32),   # lane-dense store
        grid=(grid,),
        in_specs=[pl.BlockSpec((nb, 192), lambda i: (i, 0))] + wb_specs,
        out_specs=pl.BlockSpec((nb, 256), lambda i: (i, 0)),
        compiler_params=pltpu.CompilerParams(
            dimension_semantics=("parallel",),        # v7x: split batch across the 2 TCs
            vmem_limit_bytes=64 * 1024 * 1024),       # headroom for nb up to 512-1024
    )(x_flat, *wb_args)

    return out[:N, :192].reshape(N, 3, 8, 8)


# ---------------------------------------------------------------------------
# Pure-JAX reference (unfused im2col formulation) with bf16-rounded matmul operands,
# used to check the packed/fused-matrix kernel at runtime.
# ---------------------------------------------------------------------------
def im2col(x, k, pad):
    N, H, W, C = x.shape
    xp = jnp.pad(x, ((0, 0), (pad, pad), (pad, pad), (0, 0)))
    Ho, Wo = H + 2 * pad - k + 1, W + 2 * pad - k + 1
    cols = [xp[:, di:di + Ho, dj:dj + Wo, :] for di in range(k) for dj in range(k)]
    return jnp.concatenate(cols, axis=-1)


def conv_weight_mat(w):
    Cout, Cin, kH, kW = w.shape
    return jnp.transpose(w, (2, 3, 1, 0)).reshape(kH * kW * Cin, Cout)


def convT_weight_mat(w):
    Cin, Cout, kH, kW = w.shape
    w_flip = w[:, :, ::-1, ::-1]
    return jnp.transpose(w_flip, (2, 3, 0, 1)).reshape(kH * kW * Cin, Cout)


def _mm_ref(a, w, b, relu):
    y = jnp.dot(a.astype(jnp.bfloat16), w.astype(jnp.bfloat16),
                preferred_element_type=jnp.float32) + b
    return jnp.maximum(y, 0.0) if relu else y


def reference_forward(params, x_nchw):
    N = x_nchw.shape[0]
    x = jnp.transpose(x_nchw, (0, 2, 3, 1))
    y = _mm_ref(im2col(x, 3, 1).reshape(N * 64, 27),
                conv_weight_mat(params["enc_c1_w"]), params["enc_c1_b"], True)
    y = y.reshape(N, 8, 8, 8)
    taps = jnp.stack([y[:, i::2, j::2, :] for i in (0, 1) for j in (0, 1)], axis=0)
    y = jnp.max(taps, axis=0)                                          # (N,4,4,8)
    y = _mm_ref(im2col(y, 3, 1).reshape(N * 16, 72),
                conv_weight_mat(params["enc_c2_w"]), params["enc_c2_b"], True).reshape(N, 4, 4, 8)
    y = _mm_ref(y.reshape(N * 16, 8), conv_weight_mat(params["enc_c3_w"]),
                params["enc_c3_b"], True).reshape(N, 4, 4, 8)
    flat = jnp.transpose(y, (0, 3, 1, 2)).reshape(N, 128)
    z = _mm_ref(flat, params["enc_fc_w"].T, params["enc_fc_b"], False)
    y = _mm_ref(z, params["dec_fc_w"].T, params["dec_fc_b"], False)
    y = jnp.transpose(y.reshape(N, 8, 4, 4), (0, 2, 3, 1))
    y = _mm_ref(y.reshape(N * 16, 8), params["dec_t1_w"].reshape(8, 8),
                params["dec_t1_b"], True).reshape(N, 4, 4, 8)
    yd = jnp.zeros((N, 7, 7, 8), jnp.float32).at[:, ::2, ::2, :].set(y)
    yd = jnp.pad(yd, ((0, 0), (1, 2), (1, 2), (0, 0)))
    y = _mm_ref(im2col(yd, 3, 0).reshape(N * 64, 72),
                convT_weight_mat(params["dec_t2_w"]), params["dec_t2_b"], True).reshape(N, 8, 8, 16)
    y = _mm_ref(im2col(y, 3, 1).reshape(N * 64, 144),
                convT_weight_mat(params["dec_t3_w"]), params["dec_t3_b"], False)
    return jnp.transpose(y.reshape(N, 8, 8, 3), (0, 3, 1, 2))


# ---------------------------------------------------------------------------
# Synthetic parameters (PyTorch layouts) and demo.
# ---------------------------------------------------------------------------
def init_params(key):
    ks = jax.random.split(key, 16)

    def w(k, shape, scale=0.1):
        return scale * jax.random.normal(k, shape, dtype=jnp.float32)

    return {
        "enc_c1_w": w(ks[0], (8, 3, 3, 3)),   "enc_c1_b": w(ks[1], (8,)),
        "enc_c2_w": w(ks[2], (8, 8, 3, 3)),   "enc_c2_b": w(ks[3], (8,)),
        "enc_c3_w": w(ks[4], (8, 8, 1, 1)),   "enc_c3_b": w(ks[5], (8,)),
        "enc_fc_w": w(ks[6], (64, 128)),      "enc_fc_b": w(ks[7], (64,)),
        "dec_fc_w": w(ks[8], (128, 64)),      "dec_fc_b": w(ks[9], (128,)),
        "dec_t1_w": w(ks[10], (8, 8, 1, 1)),  "dec_t1_b": w(ks[11], (8,)),
        "dec_t2_w": w(ks[12], (8, 16, 3, 3)), "dec_t2_b": w(ks[13], (16,)),
        "dec_t3_w": w(ks[14], (16, 3, 3, 3)), "dec_t3_b": w(ks[15], (3,)),
    }


if __name__ == "__main__":
    key = jax.random.PRNGKey(0)
    pkey, xkey, xkey2 = jax.random.split(key, 3)
    params = init_params(pkey)
    packed = pack_params(params)   # one-time packing, outside the jitted forward

    fwd = jax.jit(delay_autoencoder_forward)
    ref_fn = jax.jit(reference_forward)

    # Case 1: tiny batch (N=2, matching the module's natural small-shape demo).
    x = jax.random.normal(xkey, (2, 3, 8, 8), dtype=jnp.float32)
    out = jax.block_until_ready(fwd(packed, x))
    assert out.shape == (2, 3, 8, 8), out.shape
    assert bool(jnp.all(jnp.isfinite(out)))
    ref = jax.block_until_ready(ref_fn(params, x))
    # Tolerance 3e-2: the host-side L4/L5/L6 fusion changes the bf16 rounding order vs the
    # unfused reference (values here are O(1), so the drift is ~1e-3).
    max_diff = float(jnp.max(jnp.abs(out - ref)))
    assert max_diff < 3e-2, f"Pallas kernel mismatch vs reference (N=2): max |diff| = {max_diff}"

    # Case 2: batch that exercises a multi-step grid (>=2 steps) and row padding.
    x2 = jax.random.normal(xkey2, (18, 3, 8, 8), dtype=jnp.float32)
    out2 = jax.block_until_ready(fwd(packed, x2))
    assert out2.shape == (18, 3, 8, 8), out2.shape
    assert bool(jnp.all(jnp.isfinite(out2)))
    ref2 = jax.block_until_ready(ref_fn(params, x2))
    max_diff2 = float(jnp.max(jnp.abs(out2 - ref2)))
    assert max_diff2 < 3e-2, f"Pallas kernel mismatch vs reference (N=18): max |diff| = {max_diff2}"

    print("KERNEL_OK")
</pallas_src>

<mosaic_0001>
module attributes {stable_mosaic.version = 11 : i64} {
  func.func @_fused_kernel(%arg0: i32, %arg1: memref<8x192xbf16, #tpu.memory_space<vmem>>, %arg2: memref<192x512xbf16, #tpu.memory_space<vmem>>, %arg3: memref<1x512xf32, #tpu.memory_space<vmem>>, %arg4: memref<128x128xbf16, #tpu.memory_space<vmem>>, %arg5: memref<1x128xf32, #tpu.memory_space<vmem>>, %arg6: memref<128x128xbf16, #tpu.memory_space<vmem>>, %arg7: memref<1x128xf32, #tpu.memory_space<vmem>>, %arg8: memref<128x128xbf16, #tpu.memory_space<vmem>>, %arg9: memref<1x128xf32, #tpu.memory_space<vmem>>, %arg10: memref<128x1024xbf16, #tpu.memory_space<vmem>>, %arg11: memref<1x1024xf32, #tpu.memory_space<vmem>>, %arg12: memref<1024x256xbf16, #tpu.memory_space<vmem>>, %arg13: memref<1x256xf32, #tpu.memory_space<vmem>>, %arg14: memref<8x256xf32, #tpu.memory_space<vmem>>) attributes {dimension_semantics = [#tpu.dimension_semantics<parallel>], iteration_bounds = array<i64: 1>, scalar_prefetch = 0 : i64, scratch_operands = 0 : i64, tpu.core_type = #tpu.core_type<tc>, window_params = [{transform_indices = @transform_0, window_bounds = array<i64: 8, 192>}, {pipeline_mode = #tpu.pipeline_mode<synchronous>, transform_indices = @transform_1, window_bounds = array<i64: 192, 512>}, {pipeline_mode = #tpu.pipeline_mode<synchronous>, transform_indices = @transform_2, window_bounds = array<i64: 1, 512>}, {pipeline_mode = #tpu.pipeline_mode<synchronous>, transform_indices = @transform_3, window_bounds = array<i64: 128, 128>}, {pipeline_mode = #tpu.pipeline_mode<synchronous>, transform_indices = @transform_4, window_bounds = array<i64: 1, 128>}, {pipeline_mode = #tpu.pipeline_mode<synchronous>, transform_indices = @transform_5, window_bounds = array<i64: 128, 128>}, {pipeline_mode = #tpu.pipeline_mode<synchronous>, transform_indices = @transform_6, window_bounds = array<i64: 1, 128>}, {pipeline_mode = #tpu.pipeline_mode<synchronous>, transform_indices = @transform_7, window_bounds = array<i64: 128, 128>}, {pipeline_mode = #tpu.pipeline_mode<synchronous>, transform_indices = @transform_8, window_bounds = array<i64: 1, 128>}, {pipeline_mode = #tpu.pipeline_mode<synchronous>, transform_indices = @transform_9, window_bounds = array<i64: 128, 1024>}, {pipeline_mode = #tpu.pipeline_mode<synchronous>, transform_indices = @transform_10, window_bounds = array<i64: 1, 1024>}, {pipeline_mode = #tpu.pipeline_mode<synchronous>, transform_indices = @transform_11, window_bounds = array<i64: 1024, 256>}, {pipeline_mode = #tpu.pipeline_mode<synchronous>, transform_indices = @transform_12, window_bounds = array<i64: 1, 256>}, {transform_indices = @transform_13, window_bounds = array<i64: 8, 256>}]} {
    %c0 = arith.constant 0 : index
    %c0_0 = arith.constant 0 : index
    %0 = vector.load %arg1[%c0, %c0_0] : memref<8x192xbf16, #tpu.memory_space<vmem>>, vector<8x192xbf16>
    %c0_1 = arith.constant 0 : index
    %c0_2 = arith.constant 0 : index
    %1 = vector.load %arg2[%c0_1, %c0_2] : memref<192x512xbf16, #tpu.memory_space<vmem>>, vector<192x512xbf16>
    %cst = arith.constant dense<0.000000e+00> : vector<8x512xf32>
    %2 = tpu.matmul %0, %1, %cst {dimension_numbers = #tpu.dot_dimension_numbers<[1], [0], [0], [1], [0, 0, 1, 1], [], []>} : vector<8x192xbf16>, vector<192x512xbf16>, vector<8x512xf32> -> vector<8x512xf32>
    %c0_3 = arith.constant 0 : index
    %c0_4 = arith.constant 0 : index
    %3 = vector.load %arg3[%c0_3, %c0_4] : memref<1x512xf32, #tpu.memory_space<vmem>>, vector<1x512xf32>
    %4 = vector.broadcast %3 : vector<1x512xf32> to vector<8x512xf32>
    %5 = arith.addf %2, %4 : vector<8x512xf32>
    %cst_5 = arith.constant 0.000000e+00 : f32
    %6 = vector.broadcast %cst_5 : f32 to vector<8x512xf32>
    %7 = arith.maximumf %5, %6 : vector<8x512xf32>
    %8 = vector.extract_strided_slice %7 {offsets = [0, 0], sizes = [8, 128], strides = [1, 1]} : vector<8x512xf32> to vector<8x128xf32>
    %9 = vector.extract_strided_slice %7 {offsets = [0, 128], sizes = [8, 128], strides = [1, 1]} : vector<8x512xf32> to vector<8x128xf32>
    %10 = arith.maximumf %8, %9 : vector<8x128xf32>
    %11 = vector.extract_strided_slice %7 {offsets = [0, 256], sizes = [8, 128], strides = [1, 1]} : vector<8x512xf32> to vector<8x128xf32>
    %12 = vector.extract_strided_slice %7 {offsets = [0, 384], sizes = [8, 128], strides = [1, 1]} : vector<8x512xf32> to vector<8x128xf32>
    %13 = arith.maximumf %11, %12 : vector<8x128xf32>
    %14 = arith.maximumf %10, %13 : vector<8x128xf32>
    %15 = arith.truncf %14 : vector<8x128xf32> to vector<8x128xbf16>
    %c0_6 = arith.constant 0 : index
    %c0_7 = arith.constant 0 : index
    %16 = vector.load %arg4[%c0_6, %c0_7] : memref<128x128xbf16, #tpu.memory_space<vmem>>, vector<128x128xbf16>
    %cst_8 = arith.constant dense<0.000000e+00> : vector<8x128xf32>
    %17 = tpu.matmul %15, %16, %cst_8 {dimension_numbers = #tpu.dot_dimension_numbers<[1], [0], [0], [1], [0, 0, 1, 1], [], []>} : vector<8x128xbf16>, vector<128x128xbf16>, vector<8x128xf32> -> vector<8x128xf32>
    %c0_9 = arith.constant 0 : index
    %c0_10 = arith.constant 0 : index
    %18 = vector.load %arg5[%c0_9, %c0_10] : memref<1x128xf32, #tpu.memory_space<vmem>>, vector<1x128xf32>
    %19 = vector.broadcast %18 : vector<1x128xf32> to vector<8x128xf32>
    %20 = arith.addf %17, %19 : vector<8x128xf32>
    %cst_11 = arith.constant 0.000000e+00 : f32
    %21 = vector.broadcast %cst_11 : f32 to vector<8x128xf32>
    %22 = arith.maximumf %20, %21 : vector<8x128xf32>
    %23 = arith.truncf %22 : vector<8x128xf32> to vector<8x128xbf16>
    %c0_12 = arith.constant 0 : index
    %c0_13 = arith.constant 0 : index
    %24 = vector.load %arg6[%c0_12, %c0_13] : memref<128x128xbf16, #tpu.memory_space<vmem>>, vector<128x128xbf16>
    %cst_14 = arith.constant dense<0.000000e+00> : vector<8x128xf32>
    %25 = tpu.matmul %23, %24, %cst_14 {dimension_numbers = #tpu.dot_dimension_numbers<[1], [0], [0], [1], [0, 0, 1, 1], [], []>} : vector<8x128xbf16>, vector<128x128xbf16>, vector<8x128xf32> -> vector<8x128xf32>
    %c0_15 = arith.constant 0 : index
    %c0_16 = arith.constant 0 : index
    %26 = vector.load %arg7[%c0_15, %c0_16] : memref<1x128xf32, #tpu.memory_space<vmem>>, vector<1x128xf32>
    %27 = vector.broadcast %26 : vector<1x128xf32> to vector<8x128xf32>
    %28 = arith.addf %25, %27 : vector<8x128xf32>
    %cst_17 = arith.constant 0.000000e+00 : f32
    %29 = vector.broadcast %cst_17 : f32 to vector<8x128xf32>
    %30 = arith.maximumf %28, %29 : vector<8x128xf32>
    %31 = arith.truncf %30 : vector<8x128xf32> to vector<8x128xbf16>
    %c0_18 = arith.constant 0 : index
    %c0_19 = arith.constant 0 : index
    %32 = vector.load %arg8[%c0_18, %c0_19] : memref<128x128xbf16, #tpu.memory_space<vmem>>, vector<128x128xbf16>
    %cst_20 = arith.constant dense<0.000000e+00> : vector<8x128xf32>
    %33 = tpu.matmul %31, %32, %cst_20 {dimension_numbers = #tpu.dot_dimension_numbers<[1], [0], [0], [1], [0, 0, 1, 1], [], []>} : vector<8x128xbf16>, vector<128x128xbf16>, vector<8x128xf32> -> vector<8x128xf32>
    %c0_21 = arith.constant 0 : index
    %c0_22 = arith.constant 0 : index
    %34 = vector.load %arg9[%c0_21, %c0_22] : memref<1x128xf32, #tpu.memory_space<vmem>>, vector<1x128xf32>
    %35 = vector.broadcast %34 : vector<1x128xf32> to vector<8x128xf32>
    %36 = arith.addf %33, %35 : vector<8x128xf32>
    %cst_23 = arith.constant 0.000000e+00 : f32
    %37 = vector.broadcast %cst_23 : f32 to vector<8x128xf32>
    %38 = arith.maximumf %36, %37 : vector<8x128xf32>
    %39 = arith.truncf %38 : vector<8x128xf32> to vector<8x128xbf16>
    %c0_24 = arith.constant 0 : index
    %c0_25 = arith.constant 0 : index
    %40 = vector.load %arg10[%c0_24, %c0_25] : memref<128x1024xbf16, #tpu.memory_space<vmem>>, vector<128x1024xbf16>
    %cst_26 = arith.constant dense<0.000000e+00> : vector<8x1024xf32>
    %41 = tpu.matmul %39, %40, %cst_26 {dimension_numbers = #tpu.dot_dimension_numbers<[1], [0], [0], [1], [0, 0, 1, 1], [], []>} : vector<8x128xbf16>, vector<128x1024xbf16>, vector<8x1024xf32> -> vector<8x1024xf32>
    %c0_27 = arith.constant 0 : index
    %c0_28 = arith.constant 0 : index
    %42 = vector.load %arg11[%c0_27, %c0_28] : memref<1x1024xf32, #tpu.memory_space<vmem>>, vector<1x1024xf32>
    %43 = vector.broadcast %42 : vector<1x1024xf32> to vector<8x1024xf32>
    %44 = arith.addf %41, %43 : vector<8x1024xf32>
    %cst_29 = arith.constant 0.000000e+00 : f32
    %45 = vector.broadcast %cst_29 : f32 to vector<8x1024xf32>
    %46 = arith.maximumf %44, %45 : vector<8x1024xf32>
    %47 = arith.truncf %46 : vector<8x1024xf32> to vector<8x1024xbf16>
    %c0_30 = arith.constant 0 : index
    %c0_31 = arith.constant 0 : index
    %48 = vector.load %arg12[%c0_30, %c0_31] : memref<1024x256xbf16, #tpu.memory_space<vmem>>, vector<1024x256xbf16>
    %cst_32 = arith.constant dense<0.000000e+00> : vector<8x256xf32>
    %49 = tpu.matmul %47, %48, %cst_32 {dimension_numbers = #tpu.dot_dimension_numbers<[1], [0], [0], [1], [0, 0, 1, 1], [], []>} : vector<8x1024xbf16>, vector<1024x256xbf16>, vector<8x256xf32> -> vector<8x256xf32>
    %c0_33 = arith.constant 0 : index
    %c0_34 = arith.constant 0 : index
    %50 = vector.load %arg13[%c0_33, %c0_34] : memref<1x256xf32, #tpu.memory_space<vmem>>, vector<1x256xf32>
    %51 = vector.broadcast %50 : vector<1x256xf32> to vector<8x256xf32>
    %52 = arith.addf %49, %51 : vector<8x256xf32>
    %c0_35 = arith.constant 0 : index
    %c0_36 = arith.constant 0 : index
    %53 = vector.load %arg14[%c0_35, %c0_36] : memref<8x256xf32, #tpu.memory_space<vmem>>, vector<8x256xf32>
    tpu.vector_store %arg14[%c0_35, %c0_36], %52 {strides = array<i32>} : memref<8x256xf32, #tpu.memory_space<vmem>>, vector<8x256xf32>,
    return
  }
  func.func @transform_0(%arg0: i32) -> (i32, i32) {
    %c0_i32 = arith.constant 0 : i32
    %c0_i32_0 = arith.constant 0 : i32
    return %arg0, %c0_i32 : i32, i32
  }
  func.func @transform_1(%arg0: i32) -> (i32, i32) {
    %c0_i32 = arith.constant 0 : i32
    %c0_i32_0 = arith.constant 0 : i32
    %c0_i32_1 = arith.constant 0 : i32
    return %c0_i32, %c0_i32_0 : i32, i32
  }
  func.func @transform_2(%arg0: i32) -> (i32, i32) {
    %c0_i32 = arith.constant 0 : i32
    %c0_i32_0 = arith.constant 0 : i32
    %c0_i32_1 = arith.constant 0 : i32
    return %c0_i32, %c0_i32_0 : i32, i32
  }
  func.func @transform_3(%arg0: i32) -> (i32, i32) {
    %c0_i32 = arith.constant 0 : i32
    %c0_i32_0 = arith.constant 0 : i32
    %c0_i32_1 = arith.constant 0 : i32
    return %c0_i32, %c0_i32_0 : i32, i32
  }
  func.func @transform_4(%arg0: i32) -> (i32, i32) {
    %c0_i32 = arith.constant 0 : i32
    %c0_i32_0 = arith.constant 0 : i32
    %c0_i32_1 = arith.constant 0 : i32
    return %c0_i32, %c0_i32_0 : i32, i32
  }
  func.func @transform_5(%arg0: i32) -> (i32, i32) {
    %c0_i32 = arith.constant 0 : i32
    %c0_i32_0 = arith.constant 0 : i32
    %c0_i32_1 = arith.constant 0 : i32
    return %c0_i32, %c0_i32_0 : i32, i32
  }
  func.func @transform_6(%arg0: i32) -> (i32, i32) {
    %c0_i32 = arith.constant 0 : i32
    %c0_i32_0 = arith.constant 0 : i32
    %c0_i32_1 = arith.constant 0 : i32
    return %c0_i32, %c0_i32_0 : i32, i32
  }
  func.func @transform_7(%arg0: i32) -> (i32, i32) {
    %c0_i32 = arith.constant 0 : i32
    %c0_i32_0 = arith.constant 0 : i32
    %c0_i32_1 = arith.constant 0 : i32
    return %c0_i32, %c0_i32_0 : i32, i32
  }
  func.func @transform_8(%arg0: i32) -> (i32, i32) {
    %c0_i32 = arith.constant 0 : i32
    %c0_i32_0 = arith.constant 0 : i32
    %c0_i32_1 = arith.constant 0 : i32
    return %c0_i32, %c0_i32_0 : i32, i32
  }
  func.func @transform_9(%arg0: i32) -> (i32, i32) {
    %c0_i32 = arith.constant 0 : i32
    %c0_i32_0 = arith.constant 0 : i32
    %c0_i32_1 = arith.constant 0 : i32
    return %c0_i32, %c0_i32_0 : i32, i32
  }
  func.func @transform_10(%arg0: i32) -> (i32, i32) {
    %c0_i32 = arith.constant 0 : i32
    %c0_i32_0 = arith.constant 0 : i32
    %c0_i32_1 = arith.constant 0 : i32
    return %c0_i32, %c0_i32_0 : i32, i32
  }
  func.func @transform_11(%arg0: i32) -> (i32, i32) {
    %c0_i32 = arith.constant 0 : i32
    %c0_i32_0 = arith.constant 0 : i32
    %c0_i32_1 = arith.constant 0 : i32
    return %c0_i32, %c0_i32_0 : i32, i32
  }
  func.func @transform_12(%arg0: i32) -> (i32, i32) {
    %c0_i32 = arith.constant 0 : i32
    %c0_i32_0 = arith.constant 0 : i32
    %c0_i32_1 = arith.constant 0 : i32
    return %c0_i32, %c0_i32_0 : i32, i32
  }
  func.func @transform_13(%arg0: i32) -> (i32, i32) {
    %c0_i32 = arith.constant 0 : i32
    %c0_i32_0 = arith.constant 0 : i32
    return %arg0, %c0_i32 : i32, i32
  }
}

</mosaic_0001>

<bundles_post_ra>
// kernel: delay_autoencoder_forward.1
= control target key start
LH: loop header
LB: loop body
LE: loop exit
PB: predicated region body
PF: predicated region fallthrough
CT: control target
= control target key end

     0   :  { %18 = vsyncpa [#allocation3], 0  ;;  %s3898_s0 = inlined_call_operand.hbm [shape: bf16[8,192], index: 0, kind: input, shape index: {}]   ;;  %s3899_s1 = inlined_call_operand.hbm [shape: bf16[192,512], index: 1, kind: input, shape index: {}]   ;;  %s3900_s2 = inlined_call_operand.hbm [shape: f32[1,512], index: 2, kind: input, shape index: {}]   ;;  %s3901_s3 = inlined_call_operand.hbm [shape: bf16[128,128], index: 3, kind: input, shape index: {}]   ;;  %s3902_s4 = inlined_call_operand.hbm [shape: f32[1,128], index: 4, kind: input, shape index: {}]   ;;  %s3903_s5 = inlined_call_operand.hbm [shape: bf16[128,128], index: 5, kind: input, shape index: {}]   ;;  %s3904_s6 = inlined_call_operand.hbm [shape: f32[1,128], index: 6, kind: input, shape index: {}]   ;;  %s3905_s7 = inlined_call_operand.hbm [shape: bf16[128,128], index: 7, kind: input, shape index: {}]   ;;  %s3906_s8 = inlined_call_operand.hbm [shape: f32[1,128], index: 8, kind: input, shape index: {}]   ;;  %s3907_s9 = inlined_call_operand.hbm [shape: bf16[128,1024], index: 9, kind: input, shape index: {}]   ;;  %s3908_s10 = inlined_call_operand.hbm [shape: f32[1,1024], index: 10, kind: input, shape index: {}]   ;;  %s3909_s11 = inlined_call_operand.hbm [shape: bf16[1024,256], index: 11, kind: input, shape index: {}]   ;;  %s3910_s12 = inlined_call_operand.hbm [shape: f32[1,256], index: 12, kind: input, shape index: {}]   ;;  %s3911_s13 = inlined_call_operand.hbm [shape: f32[8,256], index: 13, kind: output, shape index: {}]  }
   0x1   :  { %19 = vsyncpa [#allocation6], 0 }
   0x2   :  { %20 = vsyncpa [#allocation9], 0 }
   0x3   :  { %21 = vsyncpa [#allocation12], 0 }
   0x4   :  { %22 = vsyncpa [#allocation15], 0 }
   0x5   :  { %23 = vsyncpa [#allocation18], 0 }
   0x6   :  { %24 = vsyncpa [#allocation21], 0 }
   0x7   :  { %25 = vsyncpa [#allocation4], 0  ;;  %s3540_s25 = smov [#allocation5]   ;;  %s3216_s29 = scalar_lea.hbm %s3899_s1, 6144 }
   0x8   :  { %s41_s26 = sshll.u32 %s3540_s25, 4  ;;  %p3217_p0 = scmp.ne.s32.totalorder %s3899_s1, %s3216_s29  ;;  %s42_s26 = int_to_ptr.vmem [resolvable:$true] %s41_s26 }
   0x9   :  { %p3220_p1 = scmp.lt.u32.totalorder %s3216_s29, %s3899_s1 }
   0xb   :  { %p3222_p2 = pnand %p3220_p1, %p3217_p0 }
   0xd   :  { %3225 = shalt.err (!%p3222_p2)
}
   0xe   :  { %s3226_s17 = scalar_lea.vmem %s42_s26, 6144  ;;  %p3231_p4 = scmp.lt.s32.totalorder %s42_s26, %s42_s26 }
   0xf   :  { %p3227_p3 = scmp.ne.s32.totalorder %s42_s26, %s3226_s17  ;;  %p3232_p5 = scmp.lt.s32.totalorder %s3226_s17, %s3226_s17 }
  0x11   :  { %p3233_p6 = por %p3232_p5, %p3231_p4 }
  0x13   :  { %p3234_p7 = pnand %p3233_p6, %p3227_p3 }
  0x15   :  { %3237 = shalt.err (!%p3234_p7)
}
  0x16   :  { %s3541_s18 = smov 256   ;;  %s3542_s19 = smov 16  }
  0x17   :  { %47 = dma.hbm_to_vmem [thread:$0]  %s3899_s1, 6144, %s42_s26, [#allocation6], %s3541_s18, %s3541_s18, %s3542_s19  }
  0x18   :  { %s3543_s22 = smov [#allocation8]   ;;  %s3238_s27 = scalar_lea.hbm %s3901_s3, 1024 }
  0x19   :  { %s63_s23 = sshll.u32 %s3543_s22, 4  ;;  %p3239_p8 = scmp.ne.s32.totalorder %s3901_s3, %s3238_s27  ;;  %s64_s23 = int_to_ptr.vmem [resolvable:$true] %s63_s23 }
  0x1a   :  { %p3242_p9 = scmp.lt.u32.totalorder %s3238_s27, %s3901_s3 }
  0x1c   :  { %p3244_p10 = pnand %p3242_p9, %p3239_p8 }
  0x1e   :  { %3247 = shalt.err (!%p3244_p10)
}
  0x1f   :  { %s3248_s15 = scalar_lea.vmem %s64_s23, 1024  ;;  %p3253_p12 = scmp.lt.s32.totalorder %s64_s23, %s64_s23 }
  0x20   :  { %p3249_p11 = scmp.ne.s32.totalorder %s64_s23, %s3248_s15  ;;  %p3254_p13 = scmp.lt.s32.totalorder %s3248_s15, %s3248_s15 }
  0x22   :  { %p3255_p0 = por %p3254_p13, %p3253_p12 }
  0x24   :  { %p3256_p1 = pnand %p3255_p0, %p3249_p11 }
  0x26   :  { %3259 = shalt.err (!%p3256_p1)
}
  0x27   :  { %s3544_s1 = smov 64   ;;  %s3545_s26 = smov 4  }
  0x28   :  { %69 = dma.hbm_to_vmem [thread:$0]  %s3901_s3, 1024, %s64_s23, [#allocation9], %s3544_s1, %s3544_s1, %s3545_s26  }
  0x29   :  { %s3546_s18 = smov [#allocation11]   ;;  %s3547_s20 = smov [#allocation14]  }
  0x2a   :  { %s85_s19 = sshll.u32 %s3546_s18, 4  ;;  %s107_s21 = sshll.u32 %s3547_s20, 4  ;;  %s86_s19 = int_to_ptr.vmem [resolvable:$true] %s85_s19  ;;  %s3662_s21 = int_to_ptr.vmem [resolvable:$true] %s107_s21 }
  0x2b   :  { %s3260_s25 = scalar_lea.hbm %s3903_s5, 1024 }
  0x2c   :  { %p3261_p2 = scmp.ne.s32.totalorder %s3903_s5, %s3260_s25  ;;  %p3264_p3 = scmp.lt.u32.totalorder %s3260_s25, %s3903_s5 }
  0x2e   :  { %p3266_p4 = pnand %p3264_p3, %p3261_p2 }
  0x30   :  { %3269 = shalt.err (!%p3266_p4)
}
  0x31   :  { %s3270_s3 = scalar_lea.vmem %s86_s19, 1024  ;;  %p3275_p6 = scmp.lt.s32.totalorder %s86_s19, %s86_s19 }
  0x32   :  { %p3271_p5 = scmp.ne.s32.totalorder %s86_s19, %s3270_s3  ;;  %p3276_p7 = scmp.lt.s32.totalorder %s3270_s3, %s3270_s3 }
  0x34   :  { %p3277_p8 = por %p3276_p7, %p3275_p6 }
  0x36   :  { %p3278_p9 = pnand %p3277_p8, %p3271_p5 }
  0x38   :  { %3281 = shalt.err (!%p3278_p9)
}
  0x39   :  { %91 = dma.hbm_to_vmem [thread:$0]  %s3903_s5, 1024, %s86_s19, [#allocation12], %s3544_s1, %s3544_s1, %s3545_s26  }
  0x3a   :  { %s3282_s17 = scalar_lea.hbm %s3905_s7, 1024 }
  0x3b   :  { %p3283_p10 = scmp.ne.s32.totalorder %s3905_s7, %s3282_s17  ;;  %p3286_p11 = scmp.lt.u32.totalorder %s3282_s17, %s3905_s7 }
  0x3d   :  { %p3288_p12 = pnand %p3286_p11, %p3283_p10 }
  0x3f   :  { %3291 = shalt.err (!%p3288_p12)
}
  0x40   :  { %s3292_s25 = scalar_lea.vmem %s3662_s21, 1024  ;;  %p3297_p0 = scmp.lt.s32.totalorder %s3662_s21, %s3662_s21 }
  0x41   :  { %p3293_p13 = scmp.ne.s32.totalorder %s3662_s21, %s3292_s25  ;;  %p3298_p1 = scmp.lt.s32.totalorder %s3292_s25, %s3292_s25 }
  0x43   :  { %p3299_p2 = por %p3298_p1, %p3297_p0 }
  0x45   :  { %p3300_p3 = pnand %p3299_p2, %p3293_p13 }
  0x47   :  { %3303 = shalt.err (!%p3300_p3)
}
  0x48   :  { %113 = dma.hbm_to_vmem [thread:$0]  %s3905_s7, 1024, %s3662_s21, [#allocation15], %s3544_s1, %s3544_s1, %s3545_s26  }
  0x49   :  { %s3548_s27 = smov [#allocation17]   ;;  %s3304_s3 = scalar_lea.hbm %s3907_s9, 8192 }
  0x4a   :  { %s129_s28 = sshll.u32 %s3548_s27, 4  ;;  %p3305_p4 = scmp.ne.s32.totalorder %s3907_s9, %s3304_s3  ;;  %s130_s28 = int_to_ptr.vmem [resolvable:$true] %s129_s28 }
  0x4b   :  { %p3308_p5 = scmp.lt.u32.totalorder %s3304_s3, %s3907_s9 }
  0x4d   :  { %p3310_p6 = pnand %p3308_p5, %p3305_p4 }
  0x4f   :  { %3313 = shalt.err (!%p3310_p6)
}
  0x50   :  { %s3314_s17 = scalar_lea.vmem %s130_s28, 8192  ;;  %p3319_p8 = scmp.lt.s32.totalorder %s130_s28, %s130_s28 }
  0x51   :  { %p3315_p7 = scmp.ne.s32.totalorder %s130_s28, %s3314_s17  ;;  %p3320_p9 = scmp.lt.s32.totalorder %s3314_s17, %s3314_s17 }
  0x53   :  { %p3321_p10 = por %p3320_p9, %p3319_p8 }
  0x55   :  { %p3322_p11 = pnand %p3321_p10, %p3315_p7 }
  0x57   :  { %3325 = shalt.err (!%p3322_p11)
}
  0x58   :  { %s3549_s7 = smov 512   ;;  %s3550_s1 = smov 32  }
  0x59   :  { %135 = dma.hbm_to_vmem [thread:$0]  %s3907_s9, 8192, %s130_s28, [#allocation18], %s3549_s7, %s3549_s7, %s3550_s1  }
  0x5a   :  { %s3551_s18 = smov [#allocation20]   ;;  %s3326_s25 = scalar_lea.hbm %s3909_s11, 16384 }
  0x5b   :  { %s151_s20 = sshll.u32 %s3551_s18, 4  ;;  %p3327_p12 = scmp.ne.s32.totalorder %s3909_s11, %s3326_s25  ;;  %s152_s20 = int_to_ptr.vmem [resolvable:$true] %s151_s20 }
  0x5c   :  { %p3330_p13 = scmp.lt.u32.totalorder %s3326_s25, %s3909_s11 }
  0x5e   :  { %p3332_p0 = pnand %p3330_p13, %p3327_p12 }
  0x60   :  { %3335 = shalt.err (!%p3332_p0)
}
  0x61   :  { %s3336_s30 = scalar_lea.vmem %s152_s20, 16384  ;;  %p3341_p2 = scmp.lt.s32.totalorder %s152_s20, %s152_s20 }
  0x62   :  { %p3337_p1 = scmp.ne.s32.totalorder %s152_s20, %s3336_s30  ;;  %p3342_p3 = scmp.lt.s32.totalorder %s3336_s30, %s3336_s30 }
  0x64   :  { %p3343_p4 = por %p3342_p3, %p3341_p2 }
  0x66   :  { %p3344_p5 = pnand %p3343_p4, %p3337_p1 }
  0x68   :  { %3347 = shalt.err (!%p3344_p5)
}
  0x69   :  { %s3552_s9 = smov 128   ;;  %s3553_s28 = smov 8  }
  0x6a   :  { %157 = dma.hbm_to_vmem [thread:$0]  %s3909_s11, 16384, %s152_s20, [#allocation21], %s3552_s9, %s3552_s9, %s3553_s28  }
  0x6b   :  { %s3554_s14 = smov [#allocation2]   ;;  %s3555_s16 = smov [#allocation7]  }
  0x6c   :  { %s32_s15 = sshll.u32 %s3554_s14, 4  ;;  %s54_s17 = sshll.u32 %s3555_s16, 4  ;;  %s33_s15 = int_to_ptr.vmem [resolvable:$true] %s32_s15  ;;  %s55_s17 = int_to_ptr.vmem [resolvable:$true] %s54_s17 }
  0x6d   :  { %s3348_s26 = scalar_lea.hbm %s3898_s0, 128 }
  0x6e   :  { %p3349_p6 = scmp.ne.s32.totalorder %s3898_s0, %s3348_s26  ;;  %p3352_p7 = scmp.lt.u32.totalorder %s3348_s26, %s3898_s0 }
  0x70   :  { %p3354_p8 = pnand %p3352_p7, %p3349_p6 }
  0x72   :  { %3357 = shalt.err (!%p3354_p8)
}
  0x73   :  { %s3358_s11 = scalar_lea.vmem %s33_s15, 128  ;;  %p3363_p10 = scmp.lt.s32.totalorder %s33_s15, %s33_s15 }
  0x74   :  { %p3359_p9 = scmp.ne.s32.totalorder %s33_s15, %s3358_s11  ;;  %p3364_p11 = scmp.lt.s32.totalorder %s3358_s11, %s3358_s11 }
  0x76   :  { %p3365_p12 = por %p3364_p11, %p3363_p10 }
  0x78   :  { %p3366_p13 = pnand %p3365_p12, %p3359_p9 }
  0x7a   :  { %3369 = shalt.err (!%p3366_p13)
}
  0x7b   :  { %35 = dma.hbm_to_vmem [thread:$0]  %s3898_s0, 128, %s33_s15, [#allocation3]  }
  0x7c   :  { %s3370_s27 = scalar_lea.hbm %s3900_s2, 64 }
  0x7d   :  { %p3371_p0 = scmp.ne.s32.totalorder %s3900_s2, %s3370_s27  ;;  %p3374_p1 = scmp.lt.u32.totalorder %s3370_s27, %s3900_s2 }
  0x7f   :  { %p3376_p2 = pnand %p3374_p1, %p3371_p0 }
  0x81   :  { %3379 = shalt.err (!%p3376_p2)
}
  0x82   :  { %s3380_s3 = scalar_lea.vmem %s55_s17, 64  ;;  %p3385_p4 = scmp.lt.s32.totalorder %s55_s17, %s55_s17 }
  0x83   :  { %p3381_p3 = scmp.ne.s32.totalorder %s55_s17, %s3380_s3  ;;  %p3386_p5 = scmp.lt.s32.totalorder %s3380_s3, %s3380_s3 }
  0x85   :  { %p3387_p6 = por %p3386_p5, %p3385_p4 }
  0x87   :  { %p3388_p7 = pnand %p3387_p6, %p3381_p3 }
  0x89   :  { %3391 = shalt.err (!%p3388_p7)
}
  0x8a   :  { %57 = dma.hbm_to_vmem [thread:$0]  %s3900_s2, 64, %s55_s17, [#allocation6]  }
  0x8b   :  { %s3556_s14 = smov [#allocation10]   ;;  %s3557_s16 = smov [#allocation13]  }
  0x8c   :  { %s76_s15 = sshll.u32 %s3556_s14, 4  ;;  %s98_s7 = sshll.u32 %s3557_s16, 4  ;;  %s77_s15 = int_to_ptr.vmem [resolvable:$true] %s76_s15  ;;  %s99_s7 = int_to_ptr.vmem [resolvable:$true] %s98_s7 }
  0x8d   :  { %s3392_s21 = scalar_lea.hbm %s3902_s4, 16 }
  0x8e   :  { %p3393_p8 = scmp.ne.s32.totalorder %s3902_s4, %s3392_s21  ;;  %p3396_p9 = scmp.lt.u32.totalorder %s3392_s21, %s3902_s4 }
  0x90   :  { %p3398_p10 = pnand %p3396_p9, %p3393_p8 }
  0x92   :  { %3401 = shalt.err (!%p3398_p10)
}
  0x93   :  { %s3402_s2 = scalar_lea.vmem %s77_s15, 16  ;;  %s3406_s17 = scalar_lea.vmem %s77_s15, 32 }
  0x94   :  { %p3403_p11 = scmp.ne.s32.totalorder %s77_s15, %s3402_s2  ;;  %p3407_p12 = scmp.lt.s32.totalorder %s77_s15, %s77_s15 }
  0x95   :  { %p3408_p13 = scmp.lt.s32.totalorder %s3406_s17, %s3402_s2 }
  0x97   :  { %p3409_p0 = por %p3408_p13, %p3407_p12 }
  0x99   :  { %p3410_p1 = pnand %p3409_p0, %p3403_p11 }
  0x9b   :  { %3413 = shalt.err (!%p3410_p1)
}
  0x9c   :  { %79 = dma.hbm_to_vmem [thread:$0]  %s3902_s4, 16, %s77_s15, [#allocation9]  }
  0x9d   :  { %s3414_s27 = scalar_lea.hbm %s3904_s6, 16 }
  0x9e   :  { %p3415_p2 = scmp.ne.s32.totalorder %s3904_s6, %s3414_s27  ;;  %p3418_p3 = scmp.lt.u32.totalorder %s3414_s27, %s3904_s6 }
  0xa0   :  { %p3420_p4 = pnand %p3418_p3, %p3415_p2 }
  0xa2   :  { %3423 = shalt.err (!%p3420_p4)
}
  0xa3   :  { %s3424_s3 = scalar_lea.vmem %s99_s7, 16  ;;  %s3428_s0 = scalar_lea.vmem %s99_s7, 32 }
  0xa4   :  { %p3425_p5 = scmp.ne.s32.totalorder %s99_s7, %s3424_s3  ;;  %p3429_p6 = scmp.lt.s32.totalorder %s99_s7, %s99_s7 }
  0xa5   :  { %p3430_p7 = scmp.lt.s32.totalorder %s3428_s0, %s3424_s3 }
  0xa7   :  { %p3431_p8 = por %p3430_p7, %p3429_p6 }
  0xa9   :  { %p3432_p9 = pnand %p3431_p8, %p3425_p5 }
  0xab   :  { %3435 = shalt.err (!%p3432_p9)
}
  0xac   :  { %101 = dma.hbm_to_vmem [thread:$0]  %s3904_s6, 16, %s99_s7, [#allocation12]  }
  0xad   :  { %s3558_s14 = smov [#allocation16]   ;;  %s3559_s16 = smov [#allocation19]  }
  0xae   :  { %s120_s15 = sshll.u32 %s3558_s14, 4  ;;  %s142_s1 = sshll.u32 %s3559_s16, 4  ;;  %s121_s15 = int_to_ptr.vmem [resolvable:$true] %s120_s15  ;;  %s143_s1 = int_to_ptr.vmem [resolvable:$true] %s142_s1 }
  0xaf   :  { %s3436_s18 = scalar_lea.hbm %s3906_s8, 16 }
  0xb0   :  { %p3437_p10 = scmp.ne.s32.totalorder %s3906_s8, %s3436_s18  ;;  %p3440_p11 = scmp.lt.u32.totalorder %s3436_s18, %s3906_s8 }
  0xb2   :  { %p3442_p12 = pnand %p3440_p11, %p3437_p10 }
  0xb4   :  { %3445 = shalt.err (!%p3442_p12)
}
  0xb5   :  { %s3446_s6 = scalar_lea.vmem %s121_s15, 16  ;;  %s3450_s7 = scalar_lea.vmem %s121_s15, 32 }
  0xb6   :  { %p3447_p13 = scmp.ne.s32.totalorder %s121_s15, %s3446_s6  ;;  %p3451_p0 = scmp.lt.s32.totalorder %s121_s15, %s121_s15 }
  0xb7   :  { %p3452_p1 = scmp.lt.s32.totalorder %s3450_s7, %s3446_s6 }
  0xb9   :  { %p3453_p2 = por %p3452_p1, %p3451_p0 }
  0xbb   :  { %p3454_p3 = pnand %p3453_p2, %p3447_p13 }
  0xbd   :  { %3457 = shalt.err (!%p3454_p3)
}
  0xbe   :  { %123 = dma.hbm_to_vmem [thread:$0]  %s3906_s8, 16, %s121_s15, [#allocation15]  }
  0xbf   :  { %s3458_s19 = scalar_lea.hbm %s3908_s10, 128 }
  0xc0   :  { %p3459_p4 = scmp.ne.s32.totalorder %s3908_s10, %s3458_s19  ;;  %p3462_p5 = scmp.lt.u32.totalorder %s3458_s19, %s3908_s10 }
  0xc2   :  { %p3464_p6 = pnand %p3462_p5, %p3459_p4 }
  0xc4   :  { %3467 = shalt.err (!%p3464_p6)
}
  0xc5   :  { %s3468_s28 = scalar_lea.vmem %s143_s1, 128  ;;  %p3473_p8 = scmp.lt.s32.totalorder %s143_s1, %s143_s1 }
  0xc6   :  { %p3469_p7 = scmp.ne.s32.totalorder %s143_s1, %s3468_s28  ;;  %p3474_p9 = scmp.lt.s32.totalorder %s3468_s28, %s3468_s28 }
  0xc8   :  { %p3475_p10 = por %p3474_p9, %p3473_p8 }
  0xca   :  { %p3476_p11 = pnand %p3475_p10, %p3469_p7 }
  0xcc   :  { %3479 = shalt.err (!%p3476_p11)
}
  0xcd   :  { %145 = dma.hbm_to_vmem [thread:$0]  %s3908_s10, 128, %s143_s1, [#allocation18]  }
  0xce   :  { %s3560_s0 = smov [#allocation22]   ;;  %s3480_s15 = scalar_lea.hbm %s3910_s12, 32 }
  0xcf   :  { %s164_s4 = sshll.u32 %s3560_s0, 4  ;;  %p3481_p12 = scmp.ne.s32.totalorder %s3910_s12, %s3480_s15  ;;  %s165_s4 = int_to_ptr.vmem [resolvable:$true] %s164_s4 }
  0xd0   :  { %p3484_p13 = scmp.lt.u32.totalorder %s3480_s15, %s3910_s12 }
  0xd2   :  { %p3486_p0 = pnand %p3484_p13, %p3481_p12 }
  0xd4   :  { %3489 = shalt.err (!%p3486_p0)
}
  0xd5   :  { %s3490_s22 = scalar_lea.vmem %s165_s4, 32  ;;  %p3495_p2 = scmp.lt.s32.totalorder %s165_s4, %s165_s4 }
  0xd6   :  { %p3491_p1 = scmp.ne.s32.totalorder %s165_s4, %s3490_s22  ;;  %p3496_p3 = scmp.lt.s32.totalorder %s3490_s22, %s3490_s22 }
  0xd8   :  { %p3497_p4 = por %p3496_p3, %p3495_p2 }
  0xda   :  { %p3498_p5 = pnand %p3497_p4, %p3491_p1 }
  0xdc   :  { %3501 = shalt.err (!%p3498_p5)
}
  0xdd   :  { %167 = dma.hbm_to_vmem [thread:$0]  %s3910_s12, 32, %s165_s4, [#allocation21]  }
  0xde   :  { %3524 = dma.done.wait [#allocation3], 128  }
  0xdf   :  { %3525 = vsyncadd [#allocation3], 4294967168 }
  0xe0   :  { %3526 = dma.done.wait [#allocation6], 6208  }
  0xe1   :  { %3527 = vsyncadd [#allocation6], 4294961088 }
  0xe2   :  { %3528 = dma.done.wait [#allocation9], 1040  }
  0xe3   :  { %3529 = vsyncadd [#allocation9], 4294966256 }
  0xe4   :  { %3530 = dma.done.wait [#allocation12], 1040  }
  0xe5   :  { %3531 = vsyncadd [#allocation12], 4294966256 }
  0xe6   :  { %3532 = dma.done.wait [#allocation15], 1040  }
  0xe7   :  { %3533 = vsyncadd [#allocation15], 4294966256 }
  0xe8   :  { %3534 = dma.done.wait [#allocation18], 8320  }
  0xe9   :  { %3535 = vsyncadd [#allocation18], 4294958976 }
  0xea   :  { %3536 = dma.done.wait [#allocation21], 16416  }
  0xeb   :  { %3537 = vsyncadd [#allocation21], 4294950880  ;;  %v2926_v0 = vld [vmem:[#allocation5 + $0x4] ss:$16 sps:$4 sm:$0xff]   ;;  %v2928_v1 = vld [vmem:[#allocation5] ss:$16 sps:$4 sm:$0xff]  }
  0xec   :  { %529 = vmatprep.subr.bf16.mxu0 %v2926_v0  ;;  %v2929_v2 = vld [vmem:[#allocation5 + $0x24] ss:$16 sps:$4 sm:$0xff]   ;;  %v2931_v3 = vld [vmem:[#allocation5 + $0x20] ss:$16 sps:$4 sm:$0xff]   ;;  %v208_v11 = vld [vmem:[#allocation2] sm:$0xff]  ;;  %vm525_vm0 = vcmask 523264  }
  0xed   :  { %530 = vmatpush1.bf16.msra.mxu0 %v2928_v1  ;;  %v2932_v4 = vld [vmem:[#allocation5 + $0x44] ss:$16 sps:$4 sm:$0xff]   ;;  %v2934_v5 = vld [vmem:[#allocation5 + $0x40] ss:$16 sps:$4 sm:$0xff]   ;;  %v2532_v12 = vcombine.high %v208_v11, %v208_v11  ;;  %v2966_v26 = vld [vmem:[#allocation5 + $0xc] ss:$16 sps:$4 sm:$0xff]   ;;  %v2531_v28 = vcombine.low %v208_v11, %v208_v11 }
  0xee   :  { %531 = vmatprep.subr.bf16.mxu0 %v2929_v2  ;;  %v2935_v6 = vld [vmem:[#allocation5 + $0x64] ss:$16 sps:$4 sm:$0xff]   ;;  %v2937_v7 = vld [vmem:[#allocation5 + $0x60] ss:$16 sps:$4 sm:$0xff]   ;;  %v2964_v27 = vld [vmem:[#allocation5 + $0x8] ss:$16 sps:$4 sm:$0xff]   ;;  %v259_v2 = vlaneseq }
  0xef   :  { %v2938_v8 = vld [vmem:[#allocation5 + $0x84] ss:$16 sps:$4 sm:$0xff]   ;;  %v2940_v9 = vld [vmem:[#allocation5 + $0x80] ss:$16 sps:$4 sm:$0xff]   ;;  %2581 = vmatprep.mubr.msk.bf16.mxu0 %vm525_vm0, %v2532_v12  ;;  %v2969_v29 = vld [vmem:[#allocation5 + $0x2c] ss:$16 sps:$4 sm:$0xff]  }
  0xf0   :  { %v2941_v10 = vld [vmem:[#allocation5 + $0xa4] ss:$16 sps:$4 sm:$0xff]   ;;  %v2943_v13 = vld [vmem:[#allocation5 + $0xa0] ss:$16 sps:$4 sm:$0xff]   ;;  %v2967_v30 = vld [vmem:[#allocation5 + $0x28] ss:$16 sps:$4 sm:$0xff]  }
  0xf1   :  { %532 = vmatpush1.bf16.msra.mxu0 %v2931_v3  ;;  %v2944_v14 = vld [vmem:[#allocation5 + $0xc4] ss:$16 sps:$4 sm:$0xff]   ;;  %v2946_v15 = vld [vmem:[#allocation5 + $0xc0] ss:$16 sps:$4 sm:$0xff]   ;;  %v2972_v31 = vld [vmem:[#allocation5 + $0x4c] ss:$16 sps:$4 sm:$0xff]  }
  0xf2   :  { %533 = vmatprep.subr.bf16.mxu0 %v2932_v4  ;;  %v2947_v16 = vld [vmem:[#allocation5 + $0xe4] ss:$16 sps:$4 sm:$0xff]   ;;  %v2949_v17 = vld [vmem:[#allocation5 + $0xe0] ss:$16 sps:$4 sm:$0xff]   ;;  %v2970_v32 = vld [vmem:[#allocation5 + $0x48] ss:$16 sps:$4 sm:$0xff]  }
  0xf3   :  { %v2950_v18 = vld [vmem:[#allocation5 + $0x104] ss:$16 sps:$4 sm:$0xff]   ;;  %v2952_v19 = vld [vmem:[#allocation5 + $0x100] ss:$16 sps:$4 sm:$0xff]   ;;  %v2975_v33 = vld [vmem:[#allocation5 + $0x6c] ss:$16 sps:$4 sm:$0xff]  }
  0xf4   :  { %v2953_v20 = vld [vmem:[#allocation5 + $0x124] ss:$16 sps:$4 sm:$0xff]   ;;  %v2955_v21 = vld [vmem:[#allocation5 + $0x120] ss:$16 sps:$4 sm:$0xff]   ;;  %v2973_v34 = vld [vmem:[#allocation5 + $0x68] ss:$16 sps:$4 sm:$0xff]  }
  0xf5   :  { %534 = vmatpush1.bf16.msra.mxu0 %v2934_v5  ;;  %v2956_v22 = vld [vmem:[#allocation5 + $0x144] ss:$16 sps:$4 sm:$0xff]   ;;  %v2958_v23 = vld [vmem:[#allocation5 + $0x140] ss:$16 sps:$4 sm:$0xff]   ;;  %v2978_v35 = vld [vmem:[#allocation5 + $0x8c] ss:$16 sps:$4 sm:$0xff]  }
  0xf6   :  { %535 = vmatprep.subr.bf16.mxu0 %v2935_v6  ;;  %v2959_v24 = vld [vmem:[#allocation5 + $0x164] ss:$16 sps:$4 sm:$0xff]   ;;  %v2961_v25 = vld [vmem:[#allocation5 + $0x160] ss:$16 sps:$4 sm:$0xff]   ;;  %v2976_v36 = vld [vmem:[#allocation5 + $0x88] ss:$16 sps:$4 sm:$0xff]  }
  0xf7   :  { %v2981_v37 = vld [vmem:[#allocation5 + $0xac] ss:$16 sps:$4 sm:$0xff]   ;;  %v2979_v38 = vld [vmem:[#allocation5 + $0xa8] ss:$16 sps:$4 sm:$0xff]   ;;  %v3561_v52 = vmov 0.0   ;;  %vm3562_vm1 = vmmov 0  }
  0xf8   :  { %v2984_v39 = vld [vmem:[#allocation5 + $0xcc] ss:$16 sps:$4 sm:$0xff]   ;;  %v2982_v40 = vld [vmem:[#allocation5 + $0xc8] ss:$16 sps:$4 sm:$0xff]   ;;  %2849 = vmatprep.subr.bf16.mxu1 %v3561_v52  ;;  %2865 = vmatprep.mubr.msk.bf16.mxu1 %vm3562_vm1, %v3561_v52  ;;  %v3829_v3 = vshrl.u32 %v259_v2, 7  ;;  %s3564_s12 = smov [#allocation23]  }
  0xf9   :  { %536 = vmatpush1.bf16.msra.mxu0 %v2937_v7  ;;  %v2987_v41 = vld [vmem:[#allocation5 + $0xec] ss:$16 sps:$4 sm:$0xff]   ;;  %v2985_v42 = vld [vmem:[#allocation5 + $0xe8] ss:$16 sps:$4 sm:$0xff]   ;;  %v257_v5 = vld [vmem:[#allocation7] sm:$0xf] }
  0xfa   :  { %537 = vmatprep.subr.bf16.mxu0 %v2938_v8  ;;  %v2990_v43 = vld [vmem:[#allocation5 + $0x10c] ss:$16 sps:$4 sm:$0xff]   ;;  %v2988_v44 = vld [vmem:[#allocation5 + $0x108] ss:$16 sps:$4 sm:$0xff]   ;;  %v3832_v4 = vsub.s32 0, %v3829_v3  ;;  %v3835_v6 = vsub.s32 1, %v3829_v3 }
  0xfb   :  { %v2993_v45 = vld [vmem:[#allocation5 + $0x12c] ss:$16 sps:$4 sm:$0xff]   ;;  %v2991_v46 = vld [vmem:[#allocation5 + $0x128] ss:$16 sps:$4 sm:$0xff]   ;;  %s2516_s24 = sshll.u32 %s3564_s12, 4  ;;  %s2517_s24 = int_to_ptr.vmem [resolvable:$true] %s2516_s24 }
  0xfc   :  { %v2996_v47 = vld [vmem:[#allocation5 + $0x14c] ss:$16 sps:$4 sm:$0xff]   ;;  %v2994_v48 = vld [vmem:[#allocation5 + $0x148] ss:$16 sps:$4 sm:$0xff]   ;;  %v262_v7 = vrot.slane %v257_v5, %v3832_v4  ;;  %v266_v8 = vrot.slane %v257_v5, %v3835_v6  ;;  %s3502_s11 = scalar_lea.vmem %s2517_s24, 256  ;;  %p3507_p7 = scmp.lt.s32.totalorder %s2517_s24, %s2517_s24 }
  0xfd   :  { %538 = vmatpush1.bf16.msra.mxu0 %v2940_v9  ;;  %v2999_v49 = vld [vmem:[#allocation5 + $0x16c] ss:$16 sps:$4 sm:$0xff]   ;;  %v2997_v50 = vld [vmem:[#allocation5 + $0x168] ss:$16 sps:$4 sm:$0xff]   ;;  %p3503_p6 = scmp.ne.s32.totalorder %s2517_s24, %s3502_s11  ;;  %p3508_p8 = scmp.lt.s32.totalorder %s3502_s11, %s3502_s11 }
  0xfe   :  { %539 = vmatprep.subr.bf16.mxu0 %v2941_v10  ;;  %v3000_v51 = vld [vmem:[#allocation8] sm:$0xff]   ;;  %v3001_v53 = vld [vmem:[#allocation8 + $0x8] sm:$0xff]   ;;  %v3002_v54 = vld [vmem:[#allocation8 + $0x10] sm:$0xff]  }
  0xff   :  { %v3003_v55 = vld [vmem:[#allocation8 + $0x18] sm:$0xff]   ;;  %v3004_v56 = vld [vmem:[#allocation8 + $0x20] sm:$0xff]   ;;  %v3005_v57 = vld [vmem:[#allocation8 + $0x28] sm:$0xff]   ;;  %p3509_p9 = por %p3508_p8, %p3507_p7 }
 0x100   :  { %v3006_v58 = vld [vmem:[#allocation8 + $0x30] sm:$0xff]   ;;  %v3007_v59 = vld [vmem:[#allocation8 + $0x38] sm:$0xff]   ;;  %v3008_v60 = vld [vmem:[#allocation11] sm:$0xff]  }
 0x101   :  { %540 = vmatpush1.bf16.msra.mxu0 %v2943_v13  ;;  %2850 = vmatpush3.bf16.msra.mxu1 %v3008_v60  ;;  %v3009_v61 = vld [vmem:[#allocation11 + $0x8] sm:$0xff]   ;;  %v3010_v62 = vld [vmem:[#allocation11 + $0x10] sm:$0xff]   ;;  %v3011_v63 = vld [vmem:[#allocation11 + $0x18] sm:$0xff]   ;;  %p3510_p10 = pnand %p3509_p9, %p3503_p6 }
 0x102   :  { %541 = vmatprep.subr.bf16.mxu0 %v2944_v14  ;;  %2851 = vmatprep.subr.bf16.mxu1 %v3561_v52  ;;  %v3012_v0 = vld [vmem:[#allocation11 + $0x20] sm:$0xff]   ;;  %v3013_v1 = vld [vmem:[#allocation11 + $0x28] sm:$0xff]  }
 0x105   :  { %542 = vmatpush1.bf16.msra.mxu0 %v2946_v15  ;;  %2852 = vmatpush3.bf16.msra.mxu1 %v3009_v61 }
 0x106   :  { %543 = vmatprep.subr.bf16.mxu0 %v2947_v16  ;;  %2853 = vmatprep.subr.bf16.mxu1 %v3561_v52 }
 0x109   :  { %544 = vmatpush1.bf16.msra.mxu0 %v2949_v17  ;;  %2854 = vmatpush3.bf16.msra.mxu1 %v3010_v62 }
 0x10a   :  { %545 = vmatprep.subr.bf16.mxu0 %v2950_v18  ;;  %2855 = vmatprep.subr.bf16.mxu1 %v3561_v52  ;;  %v269_v18 = vsub.s32 2, %v3829_v3 }
 0x10d   :  { %546 = vmatpush1.bf16.msra.mxu0 %v2952_v19  ;;  %2856 = vmatpush3.bf16.msra.mxu1 %v3011_v63  ;;  %v273_v19 = vsub.s32 3, %v3829_v3 }
 0x10e   :  { %547 = vmatprep.subr.bf16.mxu0 %v2953_v20  ;;  %2857 = vmatprep.subr.bf16.mxu1 %v3561_v52  ;;  %v270_v20 = vrot.slane %v257_v5, %v269_v18 }
 0x111   :  { %548 = vmatpush1.bf16.msra.mxu0 %v2955_v21  ;;  %2858 = vmatpush3.bf16.msra.mxu1 %v3012_v0  ;;  %v274_v21 = vrot.slane %v257_v5, %v273_v19  ;;  %v974_v0 = vld [vmem:[#allocation17 + $0x80] sm:$0xff] }
 0x112   :  { %549 = vmatprep.subr.bf16.mxu0 %v2956_v22  ;;  %2859 = vmatprep.subr.bf16.mxu1 %v3561_v52  ;;  %v982_v5 = vld [vmem:[#allocation17 + $0xc0] sm:$0xff] }
 0x115   :  { %550 = vmatpush1.bf16.msra.mxu0 %v2958_v23  ;;  %2860 = vmatpush3.bf16.msra.mxu1 %v3013_v1 }
 0x116   :  { %551 = vmatprep.subr.bf16.mxu0 %v2959_v24  ;;  %2861 = vmatprep.subr.bf16.mxu1 %v3561_v52 }
 0x119   :  { %552 = vmatpush1.bf16.msra.mxu0 %v2961_v25 }
 0x11a   :  { %570 = vmatprep.subr.bf16.mxu0 %v2966_v26 }
 0x11c   :  { %562 = vmatmul.mubr.bf16.vlgmr.msra.gmra.mrb[0].mxu0 %v2531_v28 }
 0x11d   :  { %571 = vmatpush1.bf16.msra.mxu0 %v2964_v27  ;;  %2582 = vmatprep.mubr.msk.bf16.mxu0 %vm525_vm0, %v2532_v12 }
 0x11e   :  { %572 = vmatprep.subr.bf16.mxu0 %v2969_v29 }
 0x121   :  { %573 = vmatpush1.bf16.msra.mxu0 %v2967_v30 }
 0x122   :  { %574 = vmatprep.subr.bf16.mxu0 %v2972_v31 }
 0x125   :  { %575 = vmatpush1.bf16.msra.mxu0 %v2970_v32 }
 0x126   :  { %576 = vmatprep.subr.bf16.mxu0 %v2975_v33  ;;  %v3014_v33 = vld [vmem:[#allocation11 + $0x30] sm:$0xff]  }
 0x127   :  { %2862 = vmatpush3.bf16.msra.mxu1 %v3014_v33 }
 0x128   :  { %2863 = vmatprep.subr.bf16.mxu1 %v3561_v52 }
 0x129   :  { %577 = vmatpush1.bf16.msra.mxu0 %v2973_v34  ;;  %v3015_v34 = vld [vmem:[#allocation11 + $0x38] sm:$0xff]  }
 0x12a   :  { %578 = vmatprep.subr.bf16.mxu0 %v2978_v35  ;;  %v3016_v35 = vld [vmem:[#allocation14] sm:$0xff]  }
 0x12b   :  { %2864 = vmatpush3.bf16.msra.mxu1 %v3015_v34 }
 0x12d   :  { %579 = vmatpush1.bf16.msra.mxu0 %v2976_v36  ;;  %v3017_v36 = vld [vmem:[#allocation14 + $0x8] sm:$0xff]  }
 0x12e   :  { %580 = vmatprep.subr.bf16.mxu0 %v2981_v37  ;;  %v3018_v37 = vld [vmem:[#allocation14 + $0x10] sm:$0xff]  }
 0x131   :  { %581 = vmatpush1.bf16.msra.mxu0 %v2979_v38  ;;  %v3019_v38 = vld [vmem:[#allocation14 + $0x18] sm:$0xff]  }
 0x132   :  { %582 = vmatprep.subr.bf16.mxu0 %v2984_v39  ;;  %v3020_v39 = vld [vmem:[#allocation14 + $0x20] sm:$0xff]  }
 0x135   :  { %583 = vmatpush1.bf16.msra.mxu0 %v2982_v40  ;;  %v3021_v40 = vld [vmem:[#allocation14 + $0x28] sm:$0xff]  }
 0x136   :  { %584 = vmatprep.subr.bf16.mxu0 %v2987_v41  ;;  %v2583_v41 = vld [vmem:[#allocation10] ss:$0 sm:$0xff] }
 0x139   :  { %585 = vmatpush1.bf16.msra.mxu0 %v2985_v42 }
 0x13a   :  { %586 = vmatprep.subr.bf16.mxu0 %v2990_v43 }
 0x13d   :  { %587 = vmatpush1.bf16.msra.mxu0 %v2988_v44 }
 0x13e   :  { %588 = vmatprep.subr.bf16.mxu0 %v2993_v45 }
 0x141   :  { %589 = vmatpush1.bf16.msra.mxu0 %v2991_v46 }
 0x142   :  { %590 = vmatprep.subr.bf16.mxu0 %v2996_v47 }
 0x145   :  { %591 = vmatpush1.bf16.msra.mxu0 %v2994_v48 }
 0x146   :  { %592 = vmatprep.subr.bf16.mxu0 %v2999_v49  ;;  %v3022_v49 = vld [vmem:[#allocation14 + $0x30] sm:$0xff]  }
 0x149   :  { %593 = vmatpush1.bf16.msra.mxu0 %v2997_v50  ;;  %v3023_v50 = vld [vmem:[#allocation14 + $0x38] sm:$0xff]  }
 0x14a   :  { %2829 = vmatprep.subr.bf16.mxu0 %v3561_v52 }
 0x14c   :  { %603 = vmatmul.mubr.bf16.vlgmr.msra.gmra.mrb[4].mxu0 %v2531_v28 }
 0x14d   :  { %2830 = vmatpush3.bf16.msra.mxu0 %v3000_v51  ;;  %2845 = vmatprep.mubr.msk.bf16.mxu0 %vm3562_vm1, %v3561_v52  ;;  %v958_v51 = vld [vmem:[#allocation17] sm:$0xff] }
 0x14e   :  { %2831 = vmatprep.subr.bf16.mxu0 %v3561_v52 }
 0x151   :  { %2832 = vmatpush3.bf16.msra.mxu0 %v3001_v53  ;;  %v962_v53 = vld [vmem:[#allocation17 + $0x20] sm:$0xff] }
 0x152   :  { %2833 = vmatprep.subr.bf16.mxu0 %v3561_v52 }
 0x155   :  { %2834 = vmatpush3.bf16.msra.mxu0 %v3002_v54  ;;  %v959_v54 = vld [vmem:[#allocation17 + $0x8] sm:$0xff] }
 0x156   :  { %2835 = vmatprep.subr.bf16.mxu0 %v3561_v52 }
 0x159   :  { %2836 = vmatpush3.bf16.msra.mxu0 %v3003_v55  ;;  %v2610_v55 = vcombine.low %v958_v51, %v962_v53 }
 0x15a   :  { %2837 = vmatprep.subr.bf16.mxu0 %v3561_v52 }
 0x15d   :  { %2838 = vmatpush3.bf16.msra.mxu0 %v3004_v56  ;;  %v2611_v56 = vcombine.high %v958_v51, %v962_v53  ;;  %v1007_v51 = vld [vmem:[#allocation17 + $0x188] sm:$0xff] }
 0x15e   :  { %2839 = vmatprep.subr.bf16.mxu0 %v3561_v52  ;;  %v1011_v53 = vld [vmem:[#allocation17 + $0x1a8] sm:$0xff] }
 0x15f   :  { %1384 = vmatprep.subr.bf16.mxu1 %v2611_v56  ;;  %v2660_v56 = vcombine.low %v1007_v51, %v1011_v53 }
 0x161   :  { %2840 = vmatpush3.bf16.msra.mxu0 %v3005_v57  ;;  %v963_v57 = vld [vmem:[#allocation17 + $0x28] sm:$0xff] }
 0x162   :  { %2841 = vmatprep.subr.bf16.mxu0 %v3561_v52  ;;  %v2612_v60 = vcombine.low %v959_v54, %v963_v57  ;;  %v2613_v61 = vcombine.high %v959_v54, %v963_v57  ;;  %v1014_v57 = vld [vmem:[#allocation17 + $0x1c0] sm:$0xff] }
 0x165   :  { %2842 = vmatpush3.bf16.msra.mxu0 %v3006_v58  ;;  %v966_v58 = vld [vmem:[#allocation17 + $0x40] sm:$0xff] }
 0x166   :  { %2843 = vmatprep.subr.bf16.mxu0 %v3561_v52 }
 0x169   :  { %2844 = vmatpush3.bf16.msra.mxu0 %v3007_v59  ;;  %v970_v59 = vld [vmem:[#allocation17 + $0x60] sm:$0xff] }
 0x16a   :  { %2869 = vmatprep.subr.bf16.mxu0 %v3561_v52  ;;  %v2619_v62 = vcombine.high %v966_v58, %v970_v59  ;;  %v2618_v63 = vcombine.low %v966_v58, %v970_v59  ;;  %v1018_v58 = vld [vmem:[#allocation17 + $0x1e0] sm:$0xff]  ;;  %v1015_v59 = vld [vmem:[#allocation17 + $0x1c8] sm:$0xff] }
 0x1ef   :  { %v563_v9 = vpop.f32.mrb[0].mxu0 }
 0x1f0   :  { %v564_v10 = vadd.f32 %v563_v9, %v262_v7  ;;  %v565_v11 = vpop.f32.mrb[1].mxu0  ;;  %v986_v7 = vld [vmem:[#allocation17 + $0xe0] sm:$0xff] }
 0x1f1   :  { %v566_v12 = vadd.f32 %v565_v11, %v266_v8  ;;  %v567_v13 = vpop.f32.mrb[2].mxu0  ;;  %v2635_v8 = vcombine.high %v982_v5, %v986_v7  ;;  %v2634_v9 = vcombine.low %v982_v5, %v986_v7  ;;  %v994_v11 = vld [vmem:[#allocation17 + $0x120] sm:$0xff]  ;;  %v965_v7 = vld [vmem:[#allocation17 + $0x38] sm:$0xff] }
 0x1f2   :  { %v611_v14 = vmax.f32 %v564_v10, 0.0  ;;  %v568_v15 = vpop.f32.mrb[3].mxu0  ;;  %v990_v10 = vld [vmem:[#allocation17 + $0x100] sm:$0xff] }
 0x1f3   :  { %v612_v16 = vmax.f32 %v566_v12, 0.0  ;;  %v2643_v12 = vcombine.high %v990_v10, %v994_v11  ;;  %v2642_v13 = vcombine.low %v990_v10, %v994_v11  ;;  %v1002_v15 = vld [vmem:[#allocation17 + $0x160] sm:$0xff]  ;;  %v3563_v11 = vmov 0  }
 0x1f5   :  { %v615_v17 = vmax.f32 %v611_v14, %v612_v16  ;;  %v998_v14 = vld [vmem:[#allocation17 + $0x140] sm:$0xff] }
 0x1f6   :  { %v2651_v16 = vcombine.high %v998_v14, %v1002_v15 }
 0x21f   :  { %v604_v22 = vpop.f32.mrb[4].mxu0 }
 0x220   :  { %v605_v23 = vadd.f32 %v604_v22, %v270_v20  ;;  %v606_v24 = vpop.f32.mrb[5].mxu0  ;;  %v1006_v20 = vld [vmem:[#allocation17 + $0x180] sm:$0xff] }
 0x221   :  { %v607_v25 = vadd.f32 %v606_v24, %v274_v21  ;;  %v608_v26 = vpop.f32.mrb[6].mxu0  ;;  %v1010_v21 = vld [vmem:[#allocation17 + $0x1a0] sm:$0xff]  ;;  %v2592_v24 = vld [vmem:[#allocation13] ss:$0 sm:$0xff] }
 0x222   :  { %v613_v27 = vmax.f32 %v605_v23, 0.0  ;;  %v609_v28 = vpop.f32.mrb[7].mxu0  ;;  %v2659_v22 = vcombine.high %v1006_v20, %v1010_v21  ;;  %v2658_v23 = vcombine.low %v1006_v20, %v1010_v21  ;;  %v972_v20 = vld [vmem:[#allocation17 + $0x70] sm:$0xff]  ;;  %v969_v21 = vld [vmem:[#allocation17 + $0x58] sm:$0xff] }
 0x223   :  { %v614_v29 = vmax.f32 %v607_v25, 0.0 }
 0x225   :  { %v616_v30 = vmax.f32 %v613_v27, %v614_v29  ;;  %v967_v29 = vld [vmem:[#allocation17 + $0x48] sm:$0xff] }
 0x227   :  { %v617_v31 = vmax.f32 %v615_v17, %v616_v30  ;;  %v2650_v17 = vcombine.low %v998_v14, %v1002_v15  ;;  %v971_v30 = vld [vmem:[#allocation17 + $0x68] sm:$0xff] }
 0x228   :  { %v2621_v34 = vcombine.high %v967_v29, %v971_v30 }
 0x229   :  { %v618_v32 = vpack.c.bf16 %v617_v31, %v617_v31 }
 0x22b   :  { %2846 = vmatmul.mubr.bf16.vlgmr.msra.gmra.mrb[8].mxu0 %v618_v32 }
 0x22c   :  { %2885 = vmatprep.mubr.msk.bf16.mxu0 %vm3562_vm1, %v3561_v52  ;;  %2870 = vmatpush3.bf16.msra.mxu0 %v3016_v35  ;;  %v975_v35 = vld [vmem:[#allocation17 + $0x88] sm:$0xff] }
 0x22d   :  { %2871 = vmatprep.subr.bf16.mxu0 %v3561_v52 }
 0x230   :  { %2872 = vmatpush3.bf16.msra.mxu0 %v3017_v36  ;;  %v979_v36 = vld [vmem:[#allocation17 + $0xa8] sm:$0xff] }
 0x231   :  { %2873 = vmatprep.subr.bf16.mxu0 %v3561_v52 }
 0x234   :  { %2874 = vmatpush3.bf16.msra.mxu0 %v3018_v37  ;;  %v2620_v37 = vcombine.low %v967_v29, %v971_v30  ;;  %v980_v29 = vld [vmem:[#allocation17 + $0xb0] sm:$0xff]  ;;  %v977_v30 = vld [vmem:[#allocation17 + $0x98] sm:$0xff] }
 0x235   :  { %2875 = vmatprep.subr.bf16.mxu0 %v3561_v52 }
 0x238   :  { %2876 = vmatpush3.bf16.msra.mxu0 %v3019_v38  ;;  %v2629_v38 = vcombine.high %v975_v35, %v979_v36 }
 0x239   :  { %2877 = vmatprep.subr.bf16.mxu0 %v3561_v52 }
 0x23c   :  { %2878 = vmatpush3.bf16.msra.mxu0 %v3020_v39  ;;  %v983_v39 = vld [vmem:[#allocation17 + $0xc8] sm:$0xff] }
 0x23d   :  { %2879 = vmatprep.subr.bf16.mxu0 %v3561_v52 }
 0x240   :  { %2880 = vmatpush3.bf16.msra.mxu0 %v3021_v40  ;;  %v987_v40 = vld [vmem:[#allocation17 + $0xe8] sm:$0xff] }
 0x241   :  { %2881 = vmatprep.subr.bf16.mxu0 %v3561_v52 }
 0x244   :  { %2882 = vmatpush3.bf16.msra.mxu0 %v3022_v49 }
 0x245   :  { %2883 = vmatprep.subr.bf16.mxu0 %v3561_v52  ;;  %v978_v52 = vld [vmem:[#allocation17 + $0xa0] sm:$0xff] }
 0x246   :  { %v2627_v1 = vcombine.high %v974_v0, %v978_v52  ;;  %v2626_v2 = vcombine.low %v974_v0, %v978_v52  ;;  %v960_v52 = vld [vmem:[#allocation17 + $0x10] sm:$0xff] }
 0x248   :  { %2884 = vmatpush3.bf16.msra.mxu0 %v3023_v50 }
 0x249   :  { %1425 = vmatprep.subr.bf16.mxu0 %v2613_v61  ;;  %v1019_v61 = vld [vmem:[#allocation17 + $0x1e8] sm:$0xff] }
 0x24a   :  { %v2669_v0 = vcombine.high %v1015_v59, %v1019_v61 }
 0x2fe   :  { %v724_v42 = vpop.f32.mrb[8].mxu0 }
 0x2ff   :  { %v725_v43 = vadd.f32 %v2583_v41, %v724_v42  ;;  %v2847_v44 = vpop.f32.mrb[9].mxu0  ;;  %v2628_v41 = vcombine.low %v975_v35, %v979_v36  ;;  %v2637_v42 = vcombine.high %v983_v39, %v987_v40  ;;  %v984_v36 = vld [vmem:[#allocation17 + $0xd0] sm:$0xff] }
 0x300   :  { %v727_v45 = vpop.f32.mrb[10].mxu0  ;;  %v995_v44 = vld [vmem:[#allocation17 + $0x128] sm:$0xff] }
 0x301   :  { %v730_v46 = vmax.f32 %v725_v43, 0.0  ;;  %v2848_v47 = vpop.f32.mrb[11].mxu0  ;;  %v991_v43 = vld [vmem:[#allocation17 + $0x108] sm:$0xff]  ;;  %v2636_v45 = vcombine.low %v983_v39, %v987_v40  ;;  %v989_v39 = vld [vmem:[#allocation17 + $0xf8] sm:$0xff] }
 0x302   :  { %v999_v47 = vld [vmem:[#allocation17 + $0x148] sm:$0xff]  ;;  %v2644_v49 = vcombine.low %v991_v43, %v995_v44 }
 0x303   :  { %v731_v48 = vpack.c.bf16 %v730_v46, %v730_v46  ;;  %v2645_v46 = vcombine.high %v991_v43, %v995_v44  ;;  %v992_v44 = vld [vmem:[#allocation17 + $0x110] sm:$0xff] }
 0x305   :  { %2866 = vmatmul.mubr.bf16.vlgmr.msra.gmra.mrb[0].mxu1 %v731_v48  ;;  %v1003_v48 = vld [vmem:[#allocation17 + $0x168] sm:$0xff] }
 0x306   :  { %1385 = vmatpush1.bf16.msra.mxu1 %v2610_v55  ;;  %v2653_v50 = vcombine.high %v999_v47, %v1003_v48  ;;  %v2652_v54 = vcombine.low %v999_v47, %v1003_v48  ;;  %v2661_v55 = vcombine.high %v1007_v51, %v1011_v53  ;;  %1416 = vmatprep.mubr.bf16.mxu1 %v3563_v11  ;;  %v997_v47 = vld [vmem:[#allocation17 + $0x138] sm:$0xff]  ;;  %v1000_v53 = vld [vmem:[#allocation17 + $0x150] sm:$0xff] }
 0x307   :  { %1386 = vmatprep.subr.bf16.mxu1 %v2619_v62  ;;  %v2666_v62 = vcombine.low %v1014_v57, %v1018_v58 }
 0x30a   :  { %1387 = vmatpush1.bf16.msra.mxu1 %v2618_v63  ;;  %v2668_v63 = vcombine.low %v1015_v59, %v1019_v61  ;;  %v1008_v61 = vld [vmem:[#allocation17 + $0x190] sm:$0xff] }
 0x30b   :  { %1388 = vmatprep.subr.bf16.mxu1 %v2627_v1  ;;  %v964_v1 = vld [vmem:[#allocation17 + $0x30] sm:$0xff] }
 0x30c   :  { %v2615_v5 = vcombine.high %v960_v52, %v964_v1 }
 0x30e   :  { %1389 = vmatpush1.bf16.msra.mxu1 %v2626_v2  ;;  %v961_v2 = vld [vmem:[#allocation17 + $0x18] sm:$0xff] }
 0x30f   :  { %1390 = vmatprep.subr.bf16.mxu1 %v2635_v8  ;;  %v2614_v8 = vcombine.low %v960_v52, %v964_v1  ;;  %v2617_v10 = vcombine.high %v961_v2, %v965_v7 }
 0x312   :  { %1391 = vmatpush1.bf16.msra.mxu1 %v2634_v9  ;;  %v2616_v9 = vcombine.low %v961_v2, %v965_v7  ;;  %v1016_v7 = vld [vmem:[#allocation17 + $0x1d0] sm:$0xff] }
 0x313   :  { %1392 = vmatprep.subr.bf16.mxu1 %v2643_v12  ;;  %v2601_v12 = vld [vmem:[#allocation16] ss:$0 sm:$0xff] }
 0x316   :  { %1393 = vmatpush1.bf16.msra.mxu1 %v2642_v13 }
 0x317   :  { %1394 = vmatprep.subr.bf16.mxu1 %v2651_v16  ;;  %v968_v16 = vld [vmem:[#allocation17 + $0x50] sm:$0xff] }
 0x31a   :  { %1395 = vmatpush1.bf16.msra.mxu1 %v2650_v17 }
 0x31b   :  { %1396 = vmatprep.subr.bf16.mxu1 %v2659_v22  ;;  %v973_v22 = vld [vmem:[#allocation17 + $0x78] sm:$0xff] }
 0x31e   :  { %1397 = vmatpush1.bf16.msra.mxu1 %v2658_v23 }
 0x3d8   :  { %v837_v25 = vpop.f32.mrb[0].mxu1 }
 0x3d9   :  { %v838_v26 = vadd.f32 %v2592_v24, %v837_v25  ;;  %v2867_v27 = vpop.f32.mrb[1].mxu1 }
 0x3da   :  { %v840_v28 = vpop.f32.mrb[2].mxu1  ;;  %v2625_v27 = vcombine.high %v969_v21, %v973_v22 }
 0x3db   :  { %v843_v31 = vmax.f32 %v838_v26, 0.0  ;;  %v2868_v32 = vpop.f32.mrb[3].mxu1  ;;  %v2623_v26 = vcombine.high %v968_v16, %v972_v20  ;;  %v976_v28 = vld [vmem:[#allocation17 + $0x90] sm:$0xff] }
 0x3dc   :  { %v2622_v32 = vcombine.low %v968_v16, %v972_v20  ;;  %v2630_v40 = vcombine.low %v976_v28, %v980_v29  ;;  %v3029_v20 = vld [vmem:[#allocation20 + $0x4] ss:$8 sps:$4 sm:$0xff]  }
 0x3dd   :  { %v844_v33 = vpack.c.bf16 %v843_v31, %v843_v31  ;;  %v981_v31 = vld [vmem:[#allocation17 + $0xb8] sm:$0xff] }
 0x3de   :  { %v2633_v35 = vcombine.high %v977_v30, %v981_v31 }
 0x3df   :  { %2886 = vmatmul.mubr.bf16.vlgmr.msra.gmra.mrb[12].mxu0 %v844_v33  ;;  %v2624_v33 = vcombine.low %v969_v21, %v973_v22  ;;  %v3024_v21 = vld [vmem:[#allocation20 + $0x100] ss:$8 sps:$4 sm:$0xff]  }
 0x3e0   :  { %1426 = vmatpush1.bf16.msra.mxu0 %v2612_v60  ;;  %v2667_v60 = vcombine.high %v1014_v57, %v1018_v58  ;;  %1457 = vmatprep.mubr.bf16.mxu0 %v3563_v11  ;;  %v3027_v22 = vld [vmem:[#allocation20] ss:$8 sps:$4 sm:$0xff]  }
 0x3e1   :  { %1427 = vmatprep.subr.bf16.mxu0 %v2621_v34  ;;  %v2631_v34 = vcombine.high %v976_v28, %v980_v29  ;;  %v3038_v28 = vld [vmem:[#allocation20 + $0x124] ss:$8 sps:$4 sm:$0xff]  }
 0x3e2   :  { %1398 = vmatprep.subr.bf16.mxu1 %v2667_v60  ;;  %v3041_v29 = vld [vmem:[#allocation20 + $0x24] ss:$8 sps:$4 sm:$0xff]  }
 0x3e3   :  { %1399 = vmatpush1.bf16.msra.mxu1 %v2666_v62  ;;  %v1012_v62 = vld [vmem:[#allocation17 + $0x1b0] sm:$0xff] }
 0x3e4   :  { %1428 = vmatpush1.bf16.msra.mxu0 %v2620_v37  ;;  %1466 = vmatprep.subr.bf16.mxu1 %v2615_v5  ;;  %v988_v37 = vld [vmem:[#allocation17 + $0xf0] sm:$0xff]  ;;  %v2663_v2 = vcombine.high %v1008_v61, %v1012_v62 }
 0x3e5   :  { %1429 = vmatprep.subr.bf16.mxu0 %v2629_v38  ;;  %v985_v38 = vld [vmem:[#allocation17 + $0xd8] sm:$0xff]  ;;  %v2638_v48 = vcombine.low %v984_v36, %v988_v37 }
 0x3e6   :  { %v2641_v43 = vcombine.high %v985_v38, %v989_v39 }
 0x3e8   :  { %1430 = vmatpush1.bf16.msra.mxu0 %v2628_v41  ;;  %v2632_v41 = vcombine.low %v977_v30, %v981_v31  ;;  %v3036_v30 = vld [vmem:[#allocation20 + $0x120] ss:$8 sps:$4 sm:$0xff]  }
 0x3e9   :  { %1431 = vmatprep.subr.bf16.mxu0 %v2637_v42  ;;  %v2639_v42 = vcombine.high %v984_v36, %v988_v37  ;;  %v3039_v31 = vld [vmem:[#allocation20 + $0x20] ss:$8 sps:$4 sm:$0xff]   ;;  %v3053_v36 = vld [vmem:[#allocation20 + $0x44] ss:$8 sps:$4 sm:$0xff]  }
 0x3ea   :  { %v3048_v37 = vld [vmem:[#allocation20 + $0x140] ss:$8 sps:$4 sm:$0xff]  }
 0x3ec   :  { %1432 = vmatpush1.bf16.msra.mxu0 %v2636_v45  ;;  %v996_v45 = vld [vmem:[#allocation17 + $0x130] sm:$0xff] }
 0x3ed   :  { %1433 = vmatprep.subr.bf16.mxu0 %v2645_v46  ;;  %v993_v46 = vld [vmem:[#allocation17 + $0x118] sm:$0xff]  ;;  %v2646_v57 = vcombine.low %v992_v44, %v996_v45 }
 0x3ee   :  { %v2649_v51 = vcombine.high %v993_v46, %v997_v47  ;;  %v2648_v58 = vcombine.low %v993_v46, %v997_v47  ;;  %v3063_v46 = vld [vmem:[#allocation20 + $0x60] ss:$8 sps:$4 sm:$0xff]   ;;  %v3068_v47 = vld [vmem:[#allocation20 + $0x174] ss:$8 sps:$4 sm:$0xff]  }
 0x3f0   :  { %1434 = vmatpush1.bf16.msra.mxu0 %v2644_v49  ;;  %v2640_v49 = vcombine.low %v985_v38, %v989_v39  ;;  %v3051_v38 = vld [vmem:[#allocation20 + $0x40] ss:$8 sps:$4 sm:$0xff]   ;;  %v3056_v39 = vld [vmem:[#allocation20 + $0x154] ss:$8 sps:$4 sm:$0xff]  }
 0x3f1   :  { %1435 = vmatprep.subr.bf16.mxu0 %v2653_v50  ;;  %v2647_v50 = vcombine.high %v992_v44, %v996_v45  ;;  %v3065_v44 = vld [vmem:[#allocation20 + $0x64] ss:$8 sps:$4 sm:$0xff]   ;;  %v3060_v45 = vld [vmem:[#allocation20 + $0x160] ss:$8 sps:$4 sm:$0xff]  }
 0x3f4   :  { %1436 = vmatpush1.bf16.msra.mxu0 %v2652_v54  ;;  %v1004_v54 = vld [vmem:[#allocation17 + $0x170] sm:$0xff] }
 0x3f5   :  { %1437 = vmatprep.subr.bf16.mxu0 %v2661_v55  ;;  %v1001_v55 = vld [vmem:[#allocation17 + $0x158] sm:$0xff]  ;;  %v2655_v59 = vcombine.high %v1000_v53, %v1004_v54  ;;  %v2654_v52 = vcombine.low %v1000_v53, %v1004_v54  ;;  %v3077_v53 = vld [vmem:[#allocation20 + $0x84] ss:$8 sps:$4 sm:$0xff]   ;;  %v3072_v54 = vld [vmem:[#allocation20 + $0x180] ss:$8 sps:$4 sm:$0xff]  }
 0x3f8   :  { %1438 = vmatpush1.bf16.msra.mxu0 %v2660_v56  ;;  %v1005_v56 = vld [vmem:[#allocation17 + $0x178] sm:$0xff] }
 0x3f9   :  { %1439 = vmatprep.subr.bf16.mxu0 %v2669_v0  ;;  %v2657_v60 = vcombine.high %v1001_v55, %v1005_v56  ;;  %v1013_v0 = vld [vmem:[#allocation17 + $0x1b8] sm:$0xff]  ;;  %v2656_v1 = vcombine.low %v1001_v55, %v1005_v56  ;;  %v3075_v55 = vld [vmem:[#allocation20 + $0x80] ss:$8 sps:$4 sm:$0xff]  }
 0x3fa   :  { %v3080_v56 = vld [vmem:[#allocation20 + $0x194] ss:$8 sps:$4 sm:$0xff]  }
 0x3fc   :  { %1440 = vmatpush1.bf16.msra.mxu0 %v2668_v63  ;;  %v1009_v63 = vld [vmem:[#allocation17 + $0x198] sm:$0xff] }
 0x3fd   :  { %1507 = vmatprep.subr.bf16.mxu0 %v2617_v10  ;;  %v2665_v5 = vcombine.high %v1009_v63, %v1013_v0  ;;  %v1021_v10 = vld [vmem:[#allocation17 + $0x1f8] sm:$0xff] }
 0x4b2   :  { %v950_v13 = vpop.f32.mrb[12].mxu0 }
 0x4b3   :  { %v951_v14 = vadd.f32 %v2601_v12, %v950_v13  ;;  %v2887_v15 = vpop.f32.mrb[13].mxu0  ;;  %v2664_v12 = vcombine.low %v1009_v63, %v1013_v0  ;;  %v3087_v63 = vld [vmem:[#allocation20 + $0xa0] ss:$8 sps:$4 sm:$0xff]   ;;  %v3092_v0 = vld [vmem:[#allocation20 + $0x1b4] ss:$8 sps:$4 sm:$0xff]  }
 0x4b4   :  { %v953_v17 = vpop.f32.mrb[14].mxu0 }
 0x4b5   :  { %v956_v23 = vmax.f32 %v951_v14, 0.0  ;;  %v2888_v24 = vpop.f32.mrb[15].mxu0  ;;  %v3026_v17 = vld [vmem:[#allocation20 + $0x104] ss:$8 sps:$4 sm:$0xff]  }
 0x4b6   :  { %v3035_v24 = vld [vmem:[#allocation20 + $0x14] ss:$8 sps:$4 sm:$0xff]  }
 0x4b7   :  { %v3855_v25 = vpack.c.bf16 %v956_v23, %v956_v23  ;;  %v3032_v23 = vld [vmem:[#allocation20 + $0x114] ss:$8 sps:$4 sm:$0xff]  }
 0x4b9   :  { %1417 = vmatmul.mubr.bf16.vlgmr.msra.gmra.mrb[4].mxu1 %v3855_v25  ;;  %1458 = vmatmul.mubr.bf16.vlgmr.msra.gmra.mrb[16].mxu0 %v3855_v25 }
 0x4ba   :  { %1467 = vmatpush1.bf16.msra.mxu1 %v2614_v8  ;;  %1508 = vmatpush1.bf16.msra.mxu0 %v2616_v9  ;;  %v1020_v8 = vld [vmem:[#allocation17 + $0x1f0] sm:$0xff]  ;;  %v1017_v9 = vld [vmem:[#allocation17 + $0x1d8] sm:$0xff] }
 0x4bb   :  { %1468 = vmatprep.subr.bf16.mxu1 %v2623_v26  ;;  %1509 = vmatprep.subr.bf16.mxu0 %v2625_v27  ;;  %v2671_v13 = vcombine.high %v1016_v7, %v1020_v8  ;;  %v2673_v14 = vcombine.high %v1017_v9, %v1021_v10  ;;  %v2670_v15 = vcombine.low %v1016_v7, %v1020_v8  ;;  %v3030_v26 = vld [vmem:[#allocation20 + $0x110] ss:$8 sps:$4 sm:$0xff]   ;;  %v3101_v7 = vld [vmem:[#allocation20 + $0xc4] ss:$8 sps:$4 sm:$0xff]   ;;  %v3096_v8 = vld [vmem:[#allocation20 + $0x1c0] ss:$8 sps:$4 sm:$0xff]  }
 0x4bc   :  { %1498 = vmatprep.mubr.bf16.mxu1 %v3563_v11  ;;  %1539 = vmatprep.mubr.bf16.mxu0 %v3563_v11  ;;  %v2662_v11 = vcombine.low %v1008_v61, %v1012_v62  ;;  %v2672_v16 = vcombine.low %v1017_v9, %v1021_v10  ;;  %v3033_v27 = vld [vmem:[#allocation20 + $0x10] ss:$8 sps:$4 sm:$0xff]   ;;  %v3089_v61 = vld [vmem:[#allocation20 + $0xa4] ss:$8 sps:$4 sm:$0xff]   ;;  %v3084_v62 = vld [vmem:[#allocation20 + $0x1a0] ss:$8 sps:$4 sm:$0xff]  }
 0x4bd   :  { %v3099_v9 = vld [vmem:[#allocation20 + $0xc0] ss:$8 sps:$4 sm:$0xff]   ;;  %v3104_v10 = vld [vmem:[#allocation20 + $0x1d4] ss:$8 sps:$4 sm:$0xff]  }
 0x4be   :  { %1469 = vmatpush1.bf16.msra.mxu1 %v2622_v32  ;;  %1510 = vmatpush1.bf16.msra.mxu0 %v2624_v33  ;;  %v3044_v32 = vld [vmem:[#allocation20 + $0x134] ss:$8 sps:$4 sm:$0xff]  }
 0x4bf   :  { %1470 = vmatprep.subr.bf16.mxu1 %v2631_v34  ;;  %1511 = vmatprep.subr.bf16.mxu0 %v2633_v35  ;;  %v3047_v33 = vld [vmem:[#allocation20 + $0x34] ss:$8 sps:$4 sm:$0xff]   ;;  %v3042_v34 = vld [vmem:[#allocation20 + $0x130] ss:$8 sps:$4 sm:$0xff]   ;;  %v3050_v35 = vld [vmem:[#allocation20 + $0x144] ss:$8 sps:$4 sm:$0xff]  }
 0x4c2   :  { %1471 = vmatpush1.bf16.msra.mxu1 %v2630_v40  ;;  %1512 = vmatpush1.bf16.msra.mxu0 %v2632_v41  ;;  %v3059_v40 = vld [vmem:[#allocation20 + $0x54] ss:$8 sps:$4 sm:$0xff]   ;;  %v3054_v41 = vld [vmem:[#allocation20 + $0x150] ss:$8 sps:$4 sm:$0xff]  }
 0x4c3   :  { %1472 = vmatprep.subr.bf16.mxu1 %v2639_v42  ;;  %1513 = vmatprep.subr.bf16.mxu0 %v2641_v43  ;;  %v3057_v42 = vld [vmem:[#allocation20 + $0x50] ss:$8 sps:$4 sm:$0xff]   ;;  %v3062_v43 = vld [vmem:[#allocation20 + $0x164] ss:$8 sps:$4 sm:$0xff]  }
 0x4c6   :  { %1473 = vmatpush1.bf16.msra.mxu1 %v2638_v48  ;;  %1514 = vmatpush1.bf16.msra.mxu0 %v2640_v49  ;;  %v3071_v48 = vld [vmem:[#allocation20 + $0x74] ss:$8 sps:$4 sm:$0xff]   ;;  %v3066_v49 = vld [vmem:[#allocation20 + $0x170] ss:$8 sps:$4 sm:$0xff]  }
 0x4c7   :  { %1474 = vmatprep.subr.bf16.mxu1 %v2647_v50  ;;  %1515 = vmatprep.subr.bf16.mxu0 %v2649_v51  ;;  %v3069_v50 = vld [vmem:[#allocation20 + $0x70] ss:$8 sps:$4 sm:$0xff]   ;;  %v3074_v51 = vld [vmem:[#allocation20 + $0x184] ss:$8 sps:$4 sm:$0xff]  }
 0x4ca   :  { %1475 = vmatpush1.bf16.msra.mxu1 %v2646_v57  ;;  %1516 = vmatpush1.bf16.msra.mxu0 %v2648_v58  ;;  %v3083_v57 = vld [vmem:[#allocation20 + $0x94] ss:$8 sps:$4 sm:$0xff]   ;;  %v3078_v58 = vld [vmem:[#allocation20 + $0x190] ss:$8 sps:$4 sm:$0xff]  }
 0x4cb   :  { %1476 = vmatprep.subr.bf16.mxu1 %v2655_v59  ;;  %1517 = vmatprep.subr.bf16.mxu0 %v2657_v60  ;;  %v3081_v59 = vld [vmem:[#allocation20 + $0x90] ss:$8 sps:$4 sm:$0xff]   ;;  %v3086_v60 = vld [vmem:[#allocation20 + $0x1a4] ss:$8 sps:$4 sm:$0xff]  }
 0x4ce   :  { %1477 = vmatpush1.bf16.msra.mxu1 %v2654_v52  ;;  %1518 = vmatpush1.bf16.msra.mxu0 %v2656_v1  ;;  %v3095_v52 = vld [vmem:[#allocation20 + $0xb4] ss:$8 sps:$4 sm:$0xff]   ;;  %v3090_v1 = vld [vmem:[#allocation20 + $0x1b0] ss:$8 sps:$4 sm:$0xff]  }
 0x4cf   :  { %1478 = vmatprep.subr.bf16.mxu1 %v2663_v2  ;;  %1519 = vmatprep.subr.bf16.mxu0 %v2665_v5  ;;  %v3093_v2 = vld [vmem:[#allocation20 + $0xb0] ss:$8 sps:$4 sm:$0xff]   ;;  %v3098_v5 = vld [vmem:[#allocation20 + $0x1c4] ss:$8 sps:$4 sm:$0xff]  }
 0x4d2   :  { %1479 = vmatpush1.bf16.msra.mxu1 %v2662_v11  ;;  %1520 = vmatpush1.bf16.msra.mxu0 %v2664_v12  ;;  %v3107_v11 = vld [vmem:[#allocation20 + $0xd4] ss:$8 sps:$4 sm:$0xff]   ;;  %v3102_v12 = vld [vmem:[#allocation20 + $0x1d0] ss:$8 sps:$4 sm:$0xff]  }
 0x4d3   :  { %1480 = vmatprep.subr.bf16.mxu1 %v2671_v13  ;;  %1521 = vmatprep.subr.bf16.mxu0 %v2673_v14  ;;  %v3105_v13 = vld [vmem:[#allocation20 + $0xd0] ss:$8 sps:$4 sm:$0xff]   ;;  %v3110_v14 = vld [vmem:[#allocation20 + $0x1e4] ss:$8 sps:$4 sm:$0xff]  }
 0x4d6   :  { %1481 = vmatpush1.bf16.msra.mxu1 %v2670_v15  ;;  %1522 = vmatpush1.bf16.msra.mxu0 %v2672_v16  ;;  %v3113_v15 = vld [vmem:[#allocation20 + $0xe4] ss:$8 sps:$4 sm:$0xff]   ;;  %v3108_v16 = vld [vmem:[#allocation20 + $0x1e0] ss:$8 sps:$4 sm:$0xff]  }
 0x4d7   :  { %2385 = vmatprep.subr.bf16.mxu1 %v3026_v17  ;;  %2344 = vmatprep.subr.bf16.mxu0 %v3029_v20  ;;  %v3111_v17 = vld [vmem:[#allocation20 + $0xe0] ss:$8 sps:$4 sm:$0xff]   ;;  %v3116_v20 = vld [vmem:[#allocation20 + $0x1f4] ss:$8 sps:$4 sm:$0xff]  }
 0x4d9   :  { %1499 = vmatmul.mubr.bf16.vlgmr.msra.gmra.mrb[8].mxu1 %v3855_v25  ;;  %1540 = vmatmul.mubr.bf16.vlgmr.msra.gmra.mrb[20].mxu0 %v3855_v25  ;;  %v3045_v25 = vld [vmem:[#allocation20 + $0x30] ss:$8 sps:$4 sm:$0xff]  }
 0x4da   :  { %2386 = vmatpush1.bf16.msra.mxu1 %v3024_v21  ;;  %2345 = vmatpush1.bf16.msra.mxu0 %v3027_v22  ;;  %v3119_v21 = vld [vmem:[#allocation20 + $0xf4] ss:$8 sps:$4 sm:$0xff]   ;;  %v3114_v22 = vld [vmem:[#allocation20 + $0x1f0] ss:$8 sps:$4 sm:$0xff]  }
 0x4db   :  { %2387 = vmatprep.subr.bf16.mxu1 %v3032_v23  ;;  %2346 = vmatprep.subr.bf16.mxu0 %v3035_v24  ;;  %v3117_v23 = vld [vmem:[#allocation20 + $0xf0] ss:$8 sps:$4 sm:$0xff]   ;;  %v3122_v24 = vld [vmem:[#allocation20 + $0x204] ss:$8 sps:$4 sm:$0xff]  }
 0x4de   :  { %2388 = vmatpush1.bf16.msra.mxu1 %v3030_v26  ;;  %2347 = vmatpush1.bf16.msra.mxu0 %v3033_v27  ;;  %v3861_v26 = vld [vmem:[#allocation19] sm:$0xff] }
 0x4df   :  { %2389 = vmatprep.subr.bf16.mxu1 %v3038_v28  ;;  %2348 = vmatprep.subr.bf16.mxu0 %v3041_v29  ;;  %v1027_v27 = vrot.slane %v3861_v26, %v3832_v4  ;;  %v1035_v28 = vrot.slane %v3861_v26, %v269_v18  ;;  %v1031_v29 = vrot.slane %v3861_v26, %v3835_v6 }
 0x4e2   :  { %2390 = vmatpush1.bf16.msra.mxu1 %v3036_v30  ;;  %2349 = vmatpush1.bf16.msra.mxu0 %v3039_v31  ;;  %v1039_v30 = vrot.slane %v3861_v26, %v273_v19 }
 0x4e3   :  { %2391 = vmatprep.subr.bf16.mxu1 %v3044_v32  ;;  %2350 = vmatprep.subr.bf16.mxu0 %v3047_v33 }
 0x4e6   :  { %2392 = vmatpush1.bf16.msra.mxu1 %v3042_v34  ;;  %2351 = vmatpush1.bf16.msra.mxu0 %v3045_v25 }
 0x4e7   :  { %2393 = vmatprep.subr.bf16.mxu1 %v3050_v35  ;;  %2352 = vmatprep.subr.bf16.mxu0 %v3053_v36 }
 0x4ea   :  { %2394 = vmatpush1.bf16.msra.mxu1 %v3048_v37  ;;  %2353 = vmatpush1.bf16.msra.mxu0 %v3051_v38 }
 0x4eb   :  { %2395 = vmatprep.subr.bf16.mxu1 %v3056_v39  ;;  %2354 = vmatprep.subr.bf16.mxu0 %v3059_v40 }
 0x4ee   :  { %2396 = vmatpush1.bf16.msra.mxu1 %v3054_v41  ;;  %2355 = vmatpush1.bf16.msra.mxu0 %v3057_v42 }
 0x4ef   :  { %2397 = vmatprep.subr.bf16.mxu1 %v3062_v43  ;;  %2356 = vmatprep.subr.bf16.mxu0 %v3065_v44 }
 0x4f2   :  { %2398 = vmatpush1.bf16.msra.mxu1 %v3060_v45  ;;  %2357 = vmatpush1.bf16.msra.mxu0 %v3063_v46 }
 0x4f3   :  { %2399 = vmatprep.subr.bf16.mxu1 %v3068_v47  ;;  %2358 = vmatprep.subr.bf16.mxu0 %v3071_v48  ;;  %v3120_v47 = vld [vmem:[#allocation20 + $0x200] ss:$8 sps:$4 sm:$0xff]  }
 0x4f6   :  { %2400 = vmatpush1.bf16.msra.mxu1 %v3066_v49  ;;  %2359 = vmatpush1.bf16.msra.mxu0 %v3069_v50  ;;  %v3125_v49 = vld [vmem:[#allocation20 + $0x214] ss:$8 sps:$4 sm:$0xff]   ;;  %v3123_v50 = vld [vmem:[#allocation20 + $0x210] ss:$8 sps:$4 sm:$0xff]  }
 0x4f7   :  { %2401 = vmatprep.subr.bf16.mxu1 %v3074_v51  ;;  %2360 = vmatprep.subr.bf16.mxu0 %v3077_v53  ;;  %v3128_v51 = vld [vmem:[#allocation20 + $0x224] ss:$8 sps:$4 sm:$0xff]   ;;  %v3126_v53 = vld [vmem:[#allocation20 + $0x220] ss:$8 sps:$4 sm:$0xff]  }
 0x4fa   :  { %2402 = vmatpush1.bf16.msra.mxu1 %v3072_v54  ;;  %2361 = vmatpush1.bf16.msra.mxu0 %v3075_v55  ;;  %v3131_v54 = vld [vmem:[#allocation20 + $0x234] ss:$8 sps:$4 sm:$0xff]   ;;  %v3129_v55 = vld [vmem:[#allocation20 + $0x230] ss:$8 sps:$4 sm:$0xff]  }
 0x4fb   :  { %2403 = vmatprep.subr.bf16.mxu1 %v3080_v56  ;;  %2362 = vmatprep.subr.bf16.mxu0 %v3083_v57  ;;  %v3134_v56 = vld [vmem:[#allocation20 + $0x244] ss:$8 sps:$4 sm:$0xff]   ;;  %v3132_v57 = vld [vmem:[#allocation20 + $0x240] ss:$8 sps:$4 sm:$0xff]  }
 0x4fe   :  { %2404 = vmatpush1.bf16.msra.mxu1 %v3078_v58  ;;  %2363 = vmatpush1.bf16.msra.mxu0 %v3081_v59  ;;  %v3137_v58 = vld [vmem:[#allocation20 + $0x254] ss:$8 sps:$4 sm:$0xff]   ;;  %v3135_v59 = vld [vmem:[#allocation20 + $0x250] ss:$8 sps:$4 sm:$0xff]  }
 0x4ff   :  { %2405 = vmatprep.subr.bf16.mxu1 %v3086_v60  ;;  %2364 = vmatprep.subr.bf16.mxu0 %v3089_v61  ;;  %v1046_v60 = vsub.s32 5, %v3829_v3  ;;  %v3140_v61 = vld [vmem:[#allocation20 + $0x264] ss:$8 sps:$4 sm:$0xff]  }
 0x502   :  { %2406 = vmatpush1.bf16.msra.mxu1 %v3084_v62  ;;  %2365 = vmatpush1.bf16.msra.mxu0 %v3087_v63  ;;  %v1047_v62 = vrot.slane %v3861_v26, %v1046_v60  ;;  %v3138_v63 = vld [vmem:[#allocation20 + $0x260] ss:$8 sps:$4 sm:$0xff]  }
 0x503   :  { %2407 = vmatprep.subr.bf16.mxu1 %v3092_v0  ;;  %2366 = vmatprep.subr.bf16.mxu0 %v3095_v52  ;;  %v3143_v0 = vld [vmem:[#allocation20 + $0x274] ss:$8 sps:$4 sm:$0xff]   ;;  %v3192_v60 = vld [vmem:[#allocation20 + $0x380] ss:$8 sps:$4 sm:$0xff]  }
 0x506   :  { %2408 = vmatpush1.bf16.msra.mxu1 %v3090_v1  ;;  %2367 = vmatpush1.bf16.msra.mxu0 %v3093_v2 }
 0x507   :  { %2409 = vmatprep.subr.bf16.mxu1 %v3098_v5  ;;  %2368 = vmatprep.subr.bf16.mxu0 %v3101_v7 }
 0x50a   :  { %2410 = vmatpush1.bf16.msra.mxu1 %v3096_v8  ;;  %2369 = vmatpush1.bf16.msra.mxu0 %v3099_v9 }
 0x50b   :  { %2411 = vmatprep.subr.bf16.mxu1 %v3104_v10  ;;  %2370 = vmatprep.subr.bf16.mxu0 %v3107_v11  ;;  %v3141_v10 = vld [vmem:[#allocation20 + $0x270] ss:$8 sps:$4 sm:$0xff]  }
 0x50e   :  { %2412 = vmatpush1.bf16.msra.mxu1 %v3102_v12  ;;  %2371 = vmatpush1.bf16.msra.mxu0 %v3105_v13  ;;  %v3146_v13 = vld [vmem:[#allocation20 + $0x284] ss:$8 sps:$4 sm:$0xff]  }
 0x50f   :  { %2413 = vmatprep.subr.bf16.mxu1 %v3110_v14  ;;  %2372 = vmatprep.subr.bf16.mxu0 %v3113_v15 }
 0x512   :  { %2414 = vmatpush1.bf16.msra.mxu1 %v3108_v16  ;;  %2373 = vmatpush1.bf16.msra.mxu0 %v3111_v17  ;;  %v3144_v16 = vld [vmem:[#allocation20 + $0x280] ss:$8 sps:$4 sm:$0xff]   ;;  %v3149_v17 = vld [vmem:[#allocation20 + $0x294] ss:$8 sps:$4 sm:$0xff]  }
 0x513   :  { %2415 = vmatprep.subr.bf16.mxu1 %v3116_v20  ;;  %2374 = vmatprep.subr.bf16.mxu0 %v3119_v21  ;;  %v3147_v20 = vld [vmem:[#allocation20 + $0x290] ss:$8 sps:$4 sm:$0xff]   ;;  %v3152_v21 = vld [vmem:[#allocation20 + $0x2a4] ss:$8 sps:$4 sm:$0xff]  }
 0x516   :  { %2416 = vmatpush1.bf16.msra.mxu1 %v3114_v22  ;;  %2375 = vmatpush1.bf16.msra.mxu0 %v3117_v23  ;;  %v3150_v22 = vld [vmem:[#allocation20 + $0x2a0] ss:$8 sps:$4 sm:$0xff]   ;;  %v3155_v23 = vld [vmem:[#allocation20 + $0x2b4] ss:$8 sps:$4 sm:$0xff]  }
 0x517   :  { %2426 = vmatprep.subr.bf16.mxu1 %v3122_v24  ;;  %v3153_v24 = vld [vmem:[#allocation20 + $0x2b0] ss:$8 sps:$4 sm:$0xff]  }
 0x58c   :  { %v1418_v31 = vpop.f32.mrb[4].mxu1  ;;  %v1459_v32 = vpop.f32.mrb[16].mxu0 }
 0x58d   :  { %v1419_v33 = vadd.f32 %v1418_v31, %v1027_v27  ;;  %v1460_v34 = vadd.f32 %v1459_v32, %v1035_v28  ;;  %v1420_v25 = vpop.f32.mrb[5].mxu1  ;;  %v1461_v35 = vpop.f32.mrb[17].mxu0  ;;  %v3158_v27 = vld [vmem:[#allocation20 + $0x2c4] ss:$8 sps:$4 sm:$0xff]   ;;  %v3156_v28 = vld [vmem:[#allocation20 + $0x2c0] ss:$8 sps:$4 sm:$0xff]  }
 0x58e   :  { %v1421_v36 = vadd.f32 %v1420_v25, %v1031_v29  ;;  %v1462_v37 = vadd.f32 %v1461_v35, %v1039_v30  ;;  %v1422_v38 = vpop.f32.mrb[6].mxu1  ;;  %v1463_v39 = vpop.f32.mrb[18].mxu0  ;;  %v1042_v29 = vsub.s32 4, %v3829_v3  ;;  %v3161_v30 = vld [vmem:[#allocation20 + $0x2d4] ss:$8 sps:$4 sm:$0xff]   ;;  %v1054_v31 = vsub.s32 7, %v3829_v3 }
 0x58f   :  { %v1548_v40 = vmax.f32 %v1419_v33, 0.0  ;;  %v1550_v41 = vmax.f32 %v1460_v34, 0.0  ;;  %v1423_v18 = vpop.f32.mrb[7].mxu1  ;;  %v1464_v42 = vpop.f32.mrb[19].mxu0  ;;  %v3159_v32 = vld [vmem:[#allocation20 + $0x2d0] ss:$8 sps:$4 sm:$0xff]  }
 0x590   :  { %v1549_v43 = vmax.f32 %v1421_v36, 0.0  ;;  %v1551_v44 = vmax.f32 %v1462_v37, 0.0  ;;  %v1043_v33 = vrot.slane %v3861_v26, %v1042_v29  ;;  %v3164_v34 = vld [vmem:[#allocation20 + $0x2e4] ss:$8 sps:$4 sm:$0xff]   ;;  %v1055_v25 = vrot.slane %v3861_v26, %v1054_v31  ;;  %v3162_v35 = vld [vmem:[#allocation20 + $0x2e0] ss:$8 sps:$4 sm:$0xff]  }
 0x591   :  { %v1556_v19 = vpack.c.bf16 %v1548_v40, %v1548_v40  ;;  %v1558_v48 = vpack.c.bf16 %v1550_v41, %v1550_v41  ;;  %v3167_v37 = vld [vmem:[#allocation20 + $0x2f4] ss:$8 sps:$4 sm:$0xff]   ;;  %v3165_v39 = vld [vmem:[#allocation20 + $0x2f0] ss:$8 sps:$4 sm:$0xff]   ;;  %v3170_v41 = vld [vmem:[#allocation20 + $0x304] ss:$8 sps:$4 sm:$0xff]  }
 0x592   :  { %v1557_v45 = vpack.c.bf16 %v1549_v43, %v1549_v43  ;;  %v1559_v46 = vpack.c.bf16 %v1551_v44, %v1551_v44  ;;  %v3168_v42 = vld [vmem:[#allocation20 + $0x300] ss:$8 sps:$4 sm:$0xff]   ;;  %v3173_v44 = vld [vmem:[#allocation20 + $0x314] ss:$8 sps:$4 sm:$0xff]  }
 0x594   :  { %2376 = vmatprep.mubr.bf16.mxu0 %v1557_v45  ;;  %2417 = vmatprep.mubr.bf16.mxu1 %v1559_v46  ;;  %v3171_v46 = vld [vmem:[#allocation20 + $0x310] ss:$8 sps:$4 sm:$0xff]  }
 0x595   :  { %2377 = vmatmul.mubr.bf16.vlgmr.msra.gmra.mrb[24].mxu0 %v1556_v19  ;;  %2418 = vmatmul.mubr.bf16.vlgmr.msra.gmra.mrb[12].mxu1 %v1558_v48  ;;  %v3174_v19 = vld [vmem:[#allocation20 + $0x320] ss:$8 sps:$4 sm:$0xff]   ;;  %v3179_v48 = vld [vmem:[#allocation20 + $0x334] ss:$8 sps:$4 sm:$0xff]  }
 0x596   :  { %2427 = vmatpush1.bf16.msra.mxu1 %v3120_v47  ;;  %v3176_v47 = vld [vmem:[#allocation20 + $0x324] ss:$8 sps:$4 sm:$0xff]  }
 0x597   :  { %2428 = vmatprep.subr.bf16.mxu1 %v3125_v49  ;;  %v3177_v49 = vld [vmem:[#allocation20 + $0x330] ss:$8 sps:$4 sm:$0xff]  }
 0x59a   :  { %2429 = vmatpush1.bf16.msra.mxu1 %v3123_v50  ;;  %v3182_v50 = vld [vmem:[#allocation20 + $0x344] ss:$8 sps:$4 sm:$0xff]  }
 0x59b   :  { %2430 = vmatprep.subr.bf16.mxu1 %v3128_v51  ;;  %v3180_v51 = vld [vmem:[#allocation20 + $0x340] ss:$8 sps:$4 sm:$0xff]  }
 0x59e   :  { %2431 = vmatpush1.bf16.msra.mxu1 %v3126_v53  ;;  %v3185_v53 = vld [vmem:[#allocation20 + $0x354] ss:$8 sps:$4 sm:$0xff]  }
 0x59f   :  { %2432 = vmatprep.subr.bf16.mxu1 %v3131_v54  ;;  %v3183_v54 = vld [vmem:[#allocation20 + $0x350] ss:$8 sps:$4 sm:$0xff]  }
 0x5a2   :  { %2433 = vmatpush1.bf16.msra.mxu1 %v3129_v55  ;;  %v3188_v55 = vld [vmem:[#allocation20 + $0x364] ss:$8 sps:$4 sm:$0xff]  }
 0x5a3   :  { %2434 = vmatprep.subr.bf16.mxu1 %v3134_v56  ;;  %v3186_v56 = vld [vmem:[#allocation20 + $0x360] ss:$8 sps:$4 sm:$0xff]  }
 0x5a6   :  { %2435 = vmatpush1.bf16.msra.mxu1 %v3132_v57  ;;  %v3191_v57 = vld [vmem:[#allocation20 + $0x374] ss:$8 sps:$4 sm:$0xff]  }
 0x5a7   :  { %2436 = vmatprep.subr.bf16.mxu1 %v3137_v58  ;;  %v3189_v58 = vld [vmem:[#allocation20 + $0x370] ss:$8 sps:$4 sm:$0xff]  }
 0x5aa   :  { %2437 = vmatpush1.bf16.msra.mxu1 %v3135_v59  ;;  %v3194_v59 = vld [vmem:[#allocation20 + $0x384] ss:$8 sps:$4 sm:$0xff]  }
 0x5ab   :  { %2438 = vmatprep.subr.bf16.mxu1 %v3140_v61  ;;  %v3197_v61 = vld [vmem:[#allocation20 + $0x394] ss:$8 sps:$4 sm:$0xff]  }
 0x5ac   :  { %v1500_v52 = vpop.f32.mrb[8].mxu1  ;;  %v3875_v1 = vpop.f32.mrb[20].mxu0 }
 0x5ad   :  { %v1502_v2 = vpop.f32.mrb[9].mxu1  ;;  %v1543_v5 = vpop.f32.mrb[21].mxu0  ;;  %v1501_v36 = vadd.f32 %v1500_v52, %v1043_v33  ;;  %v3203_v52 = vld [vmem:[#allocation20 + $0x3b4] ss:$8 sps:$4 sm:$0xff]  }
 0x5ae   :  { %v1503_v7 = vadd.f32 %v1502_v2, %v1047_v62  ;;  %v1504_v8 = vpop.f32.mrb[10].mxu1  ;;  %v1545_v9 = vpop.f32.mrb[22].mxu0  ;;  %2439 = vmatpush1.bf16.msra.mxu1 %v3138_v63  ;;  %v1544_v38 = vadd.f32 %v1543_v5, %v1055_v25  ;;  %v3195_v62 = vld [vmem:[#allocation20 + $0x390] ss:$8 sps:$4 sm:$0xff]   ;;  %v3200_v63 = vld [vmem:[#allocation20 + $0x3a4] ss:$8 sps:$4 sm:$0xff]  }
 0x5af   :  { %v1505_v11 = vpop.f32.mrb[11].mxu1  ;;  %v1546_v12 = vpop.f32.mrb[23].mxu0  ;;  %2440 = vmatprep.subr.bf16.mxu1 %v3143_v0  ;;  %v1552_v40 = vmax.f32 %v1501_v36, 0.0  ;;  %v3198_v0 = vld [vmem:[#allocation20 + $0x3a0] ss:$8 sps:$4 sm:$0xff]   ;;  %v1050_v8 = vsub.s32 6, %v3829_v3 }
 0x5b0   :  { %v1553_v14 = vmax.f32 %v1503_v7, 0.0  ;;  %v1555_v18 = vmax.f32 %v1544_v38, 0.0  ;;  %v3201_v2 = vld [vmem:[#allocation20 + $0x3b0] ss:$8 sps:$4 sm:$0xff]   ;;  %v3206_v5 = vld [vmem:[#allocation20 + $0x3c4] ss:$8 sps:$4 sm:$0xff]  }
 0x5b1   :  { %v1560_v43 = vpack.c.bf16 %v1552_v40, %v1552_v40  ;;  %v3204_v7 = vld [vmem:[#allocation20 + $0x3c0] ss:$8 sps:$4 sm:$0xff]   ;;  %v3209_v9 = vld [vmem:[#allocation20 + $0x3d4] ss:$8 sps:$4 sm:$0xff]   ;;  %v1051_v11 = vrot.slane %v3861_v26, %v1050_v8  ;;  %v3212_v12 = vld [vmem:[#allocation20 + $0x3e4] ss:$8 sps:$4 sm:$0xff]  }
 0x5b2   :  { %v1561_v15 = vpack.c.bf16 %v1553_v14, %v1553_v14  ;;  %2441 = vmatpush1.bf16.msra.mxu1 %v3141_v10  ;;  %v1563_v45 = vpack.c.bf16 %v1555_v18, %v1555_v18  ;;  %v3207_v10 = vld [vmem:[#allocation20 + $0x3d0] ss:$8 sps:$4 sm:$0xff]   ;;  %v1692_v26 = vld [vmem:[#allocation22] sm:$0x3] }
 0x5b3   :  { %2442 = vmatprep.subr.bf16.mxu1 %v3146_v13  ;;  %v3210_v13 = vld [vmem:[#allocation20 + $0x3e0] ss:$8 sps:$4 sm:$0xff]   ;;  %v1542_v14 = vadd.f32 %v3875_v1, %v1051_v11 }
 0x5b4   :  { %2458 = vmatprep.mubr.bf16.mxu1 %v1561_v15  ;;  %v3215_v15 = vld [vmem:[#allocation20 + $0x3f4] ss:$8 sps:$4 sm:$0xff]  }
 0x5b6   :  { %2443 = vmatpush1.bf16.msra.mxu1 %v3144_v16  ;;  %v3213_v16 = vld [vmem:[#allocation20 + $0x3f0] ss:$8 sps:$4 sm:$0xff]  }
 0x5b7   :  { %2444 = vmatprep.subr.bf16.mxu1 %v3149_v17  ;;  %v1554_v17 = vmax.f32 %v1542_v14, 0.0 }
 0x5b9   :  { %v1562_v3 = vpack.c.bf16 %v1554_v17, %v1554_v17 }
 0x5ba   :  { %2445 = vmatpush1.bf16.msra.mxu1 %v3147_v20 }
 0x5bb   :  { %2446 = vmatprep.subr.bf16.mxu1 %v3152_v21 }
 0x5be   :  { %2447 = vmatpush1.bf16.msra.mxu1 %v3150_v22 }
 0x5bf   :  { %2448 = vmatprep.subr.bf16.mxu1 %v3155_v23 }
 0x5c2   :  { %2449 = vmatpush1.bf16.msra.mxu1 %v3153_v24  ;;  %v1697_v24 = vrot.slane %v1692_v26, %v3832_v4 }
 0x5c3   :  { %2450 = vmatprep.subr.bf16.mxu1 %v3158_v27  ;;  %v1701_v27 = vrot.slane %v1692_v26, %v3835_v6 }
 0x5c6   :  { %2451 = vmatpush1.bf16.msra.mxu1 %v3156_v28 }
 0x5c7   :  { %2452 = vmatprep.subr.bf16.mxu1 %v3161_v30 }
 0x5ca   :  { %2453 = vmatpush1.bf16.msra.mxu1 %v3159_v32 }
 0x5cb   :  { %2454 = vmatprep.subr.bf16.mxu1 %v3164_v34 }
 0x5ce   :  { %2455 = vmatpush1.bf16.msra.mxu1 %v3162_v35 }
 0x5cf   :  { %2456 = vmatprep.subr.bf16.mxu1 %v3167_v37 }
 0x5d2   :  { %2457 = vmatpush1.bf16.msra.mxu1 %v3165_v39 }
 0x5d3   :  { %2467 = vmatprep.subr.bf16.mxu1 %v3170_v41 }
 0x5d5   :  { %2459 = vmatmul.mubr.bf16.vlgmr.msra.gmra.mrb[12].mxu1 %v1560_v43 }
 0x5d6   :  { %2468 = vmatpush1.bf16.msra.mxu1 %v3168_v42  ;;  %2499 = vmatprep.mubr.bf16.mxu1 %v1563_v45 }
 0x5d7   :  { %2469 = vmatprep.subr.bf16.mxu1 %v3173_v44 }
 0x5da   :  { %2470 = vmatpush1.bf16.msra.mxu1 %v3171_v46 }
 0x5db   :  { %2471 = vmatprep.subr.bf16.mxu1 %v3176_v47 }
 0x5de   :  { %2472 = vmatpush1.bf16.msra.mxu1 %v3174_v19 }
 0x5df   :  { %2473 = vmatprep.subr.bf16.mxu1 %v3179_v48 }
 0x5e2   :  { %2474 = vmatpush1.bf16.msra.mxu1 %v3177_v49 }
 0x5e3   :  { %2475 = vmatprep.subr.bf16.mxu1 %v3182_v50 }
 0x5e6   :  { %2476 = vmatpush1.bf16.msra.mxu1 %v3180_v51 }
 0x5e7   :  { %2477 = vmatprep.subr.bf16.mxu1 %v3185_v53 }
 0x5ea   :  { %2478 = vmatpush1.bf16.msra.mxu1 %v3183_v54 }
 0x5eb   :  { %2479 = vmatprep.subr.bf16.mxu1 %v3188_v55 }
 0x5ee   :  { %2480 = vmatpush1.bf16.msra.mxu1 %v3186_v56 }
 0x5ef   :  { %2481 = vmatprep.subr.bf16.mxu1 %v3191_v57 }
 0x5f2   :  { %2482 = vmatpush1.bf16.msra.mxu1 %v3189_v58 }
 0x5f3   :  { %2483 = vmatprep.subr.bf16.mxu1 %v3194_v59 }
 0x5f6   :  { %2484 = vmatpush1.bf16.msra.mxu1 %v3192_v60 }
 0x5f7   :  { %2485 = vmatprep.subr.bf16.mxu1 %v3197_v61 }
 0x5fa   :  { %2486 = vmatpush1.bf16.msra.mxu1 %v3195_v62 }
 0x5fb   :  { %2487 = vmatprep.subr.bf16.mxu1 %v3200_v63 }
 0x5fe   :  { %2488 = vmatpush1.bf16.msra.mxu1 %v3198_v0 }
 0x5ff   :  { %2489 = vmatprep.subr.bf16.mxu1 %v3203_v52 }
 0x602   :  { %2490 = vmatpush1.bf16.msra.mxu1 %v3201_v2 }
 0x603   :  { %2491 = vmatprep.subr.bf16.mxu1 %v3206_v5 }
 0x606   :  { %2492 = vmatpush1.bf16.msra.mxu1 %v3204_v7 }
 0x607   :  { %2493 = vmatprep.subr.bf16.mxu1 %v3209_v9 }
 0x60a   :  { %2494 = vmatpush1.bf16.msra.mxu1 %v3207_v10 }
 0x60b   :  { %2495 = vmatprep.subr.bf16.mxu1 %v3212_v12 }
 0x60e   :  { %2496 = vmatpush1.bf16.msra.mxu1 %v3210_v13 }
 0x60f   :  { %2497 = vmatprep.subr.bf16.mxu1 %v3215_v15 }
 0x612   :  { %2498 = vmatpush1.bf16.msra.mxu1 %v3213_v16 }
 0x615   :  { %2500 = vmatmul.mubr.bf16.vlgmr.msra.gmra.mrb[12].mxu1 %v1562_v3 }
 0x668   :  { %v2378_v20 = vpop.f32.mrb[24].mxu0 }
 0x669   :  { %v2380_v21 = vpop.f32.mrb[25].mxu0  ;;  %v2379_v28 = vadd.f32 %v2378_v20, %v1697_v24 }
 0x66a   :  { %v2382_v22 = vpop.f32.mrb[26].mxu0  ;;  %v2381_v1 = vadd.f32 %v2380_v21, %v1701_v27 }
 0x66b   :  { %v2383_v23 = vpop.f32.mrb[27].mxu0 }
 0x6e8   :  { %v2501_v29 = vpop.f32.mrb[12].mxu1 }
 0x6e9   :  { %v2890_v30 = vadd.f32 %v2501_v29, %v2379_v28  ;;  %v2503_v31 = vpop.f32.mrb[13].mxu1 }
 0x6ea   :  { %v2892_v32 = vadd.f32 %v2503_v31, %v2381_v1  ;;  %v2505_v33 = vpop.f32.mrb[14].mxu1 }
 0x6eb   :  { %2508 = vst [vmem:[#allocation23] sm:$0xff] %v2890_v30  ;;  %v2506_v34 = vpop.f32.mrb[15].mxu1 }
 0x6ec   :  { %2509 = vst [vmem:[#allocation23 + $0x8] sm:$0xff] %v2892_v32 }
 0x6ed   :  { %3513 = shalt.err (!%p3510_p10)
}
 0x6ee   :  { %s3514_s7 = scalar_lea.hbm %s3911_s13, 256 }
 0x6ef   :  { %p3515_p11 = scmp.ne.s32.totalorder %s3911_s13, %s3514_s7  ;;  %p3518_p12 = scmp.lt.u32.totalorder %s3514_s7, %s3911_s13 }
 0x6f1   :  { %p3520_p13 = pnand %p3518_p12, %p3515_p11 }
 0x6f3   :  { %3523 = shalt.err (!%p3520_p13)
}
 0x6f4   :  { %2519 = dma.vmem_to_hbm [thread:$0]  %s2517_s24, 256, %s3911_s13, [#allocation4]  }
 0x6f5   :  { %3538 = dma.done.wait [#allocation4], 256  }
 0x6f6   :  { %3539 = vsyncadd [#allocation4], 4294967040 }
 0x6f7   :  { %2523 = vsyncpa [#allocation3], 1 }
 0x6f8   :  { %2524 = vsyncpa [#allocation6], 1 }
 0x6f9   :  { %2525 = vsyncpa [#allocation9], 1 }
 0x6fa   :  { %2526 = vsyncpa [#allocation12], 1 }
 0x6fb   :  { %2527 = vsyncpa [#allocation15], 1 }
 0x6fc   :  { %2528 = vsyncpa [#allocation18], 1 }
 0x6fd   :  { %2529 = vsyncpa [#allocation21], 1 }
 0x6fe   :  { %2530 = vsyncpa [#allocation4], 1 }

</bundles_post_ra>
